<compile_context>
chip_gen: v6e
topology: v6e:2x2x1
jax: 0.10.0
libtpu: 0.0.40
codegen_flags: <defaults>
</compile_context>

<pallas_src>
import numpy as np
import jax
import jax.numpy as jnp
from jax import lax
from jax.experimental import pallas as pl
from jax.experimental.pallas import tpu as pltpu

SH_DEGREE = 3
SH_C = (SH_DEGREE + 1) ** 2  # 16

TN = 128        # point tile (sublanes)
LANE_SUB = 128  # inner ray sub-chunk (lanes)


def _pick_ray_tile(R):
    # Large ray tiles amortize per-grid-step overhead and the re-streaming of
    # per-point data (they are re-fetched once per ray tile).  Keep >= 2 ray
    # tiles when R allows so the "parallel" axis can split across the two
    # TensorCores on v7x.
    for tr in (512, 256):
        if R >= 2 * tr:
            return tr
    return 128


# ----------------------------------------------------------------------------
# Pallas kernel: point-cloud splat rendering (the N x R hot path)
# ----------------------------------------------------------------------------
def _render_kernel(pos_ref, pts_ref, coeffs_ref, rays_ref, sh_ref, out_ref):
    ni = pl.program_id(1)

    # Output block is resident across the point ("arbitrary") axis: init once.
    @pl.when(ni == 0)
    def _():
        out_ref[...] = jnp.zeros_like(out_ref)

    tn = pos_ref.shape[0]
    tr = rays_ref.shape[1]
    n_chunks = tr // LANE_SUB

    # Static inner loop over 128-lane ray sub-chunks; all cross-chunk state
    # flows through out_ref, so per-chunk intermediates stay short-lived.
    for c in range(n_chunks):
        lo = c * LANE_SUB
        hi = lo + LANE_SUB

        rays = rays_ref[:, lo:hi]            # [8, SUB]  rows 0-2 org, 3-5 dir
        sh = sh_ref[:, lo:hi]                # [16, SUB] bf16
        pos = pos_ref[...]                   # [TN, 3]
        delta = pts_ref[:, 0:1]              # [TN, 1]
        weight = pts_ref[:, 1:2]             # [TN, 1]  = sigma * opacity

        # Point/ray geometry (VPU, exact f32, no cancellation).
        dist2 = jnp.zeros((tn, LANE_SUB), jnp.float32)
        dotn = jnp.zeros((tn, LANE_SUB), jnp.float32)
        for k in range(3):
            rel = pos[:, k:k + 1] - rays[k:k + 1, :]       # [TN, SUB]
            dist2 = dist2 + rel * rel
            dotn = dotn + rel * rays[3 + k:4 + k, :]

        # One rsqrt replaces sqrt + two divides on the single EUP pipe.
        inv = lax.rsqrt(dist2 + 1e-12)
        dist = dist2 * inv
        ddot = dotn * inv
        contrib = jnp.exp(-delta * (1.0 - ddot) ** 2) * weight * inv  # [TN,SUB]

        # Fused 3-channel SH matmul: [3*TN,16] @ [16,SUB] (bf16 in, f32 acc).
        logits = jnp.dot(coeffs_ref[...], sh,
                         preferred_element_type=jnp.float32)          # [3*TN,SUB]
        # sigmoid(x) == 0.5*tanh(0.5*x)+0.5 : one EUP pass instead of exp+recip.
        col = 0.5 * jnp.tanh(0.5 * logits) + 0.5

        rows = [jnp.sum(col[ch * tn:(ch + 1) * tn, :] * contrib,
                        axis=0, keepdims=True) for ch in range(3)]     # rgb sums
        rows.append(jnp.sum(contrib, axis=0, keepdims=True))           # density
        rows.append(jnp.sum(dist * contrib, axis=0, keepdims=True))    # depth sum
        rows.append(jnp.zeros((3, LANE_SUB), jnp.float32))              # pad rows
        out_ref[:, lo:hi] += jnp.concatenate(rows, axis=0)              # [8, SUB]

    # Normalize in-place once all point tiles have been accumulated.
    @pl.when(ni == pl.num_programs(1) - 1)
    def _():
        acc = out_ref[...]                                  # [8, TR]
        inv_den = 1.0 / (acc[3:4, :] + 1e-8)
        out_ref[...] = jnp.concatenate(
            [acc[0:3, :] * inv_den,      # rgb
             acc[3:4, :],                # total contribution
             acc[4:5, :] * inv_den,      # depth
             acc[5:8, :]], axis=0)


def render_points_pallas(positions, point_delta, point_weight, sh_coeffs,
                         rays_o, rays_d):
    """positions [N,3], point_delta [N], point_weight [N] (=sigma*opacity),
       sh_coeffs [N,C,3], rays_o/rays_d [R,3]  ->  rgb [3,R], depth [1,R]."""
    f32 = jnp.float32
    N = positions.shape[0]
    R = rays_o.shape[0]
    TR = _pick_ray_tile(R)
    Np = pl.cdiv(N, TN) * TN
    Rp = pl.cdiv(R, TR) * TR
    nt = Np // TN

    pos = jnp.pad(positions.astype(f32), ((0, Np - N), (0, 0)))          # [Np,3]

    # Per-point scalars packed into one sublane-aligned [Np, 8] array:
    #   col 0 = delta, col 1 = sigma*opacity (padded points get weight 0).
    pts = jnp.zeros((Np, 8), f32)
    pts = pts.at[:N, 0].set(point_delta.astype(f32))
    pts = pts.at[:N, 1].set(point_weight.astype(f32))

    # SH coefficients flattened so each point tile holds its 3 channels
    # contiguously: [nt, 3, TN, C] -> [3*Np, C], streamed as bf16.
    coeffs = jnp.transpose(sh_coeffs.astype(f32), (2, 0, 1))             # [3,N,C]
    coeffs = jnp.pad(coeffs, ((0, 0), (0, Np - N), (0, 0)))
    coeffs = coeffs.reshape(3, nt, TN, SH_C).transpose(1, 0, 2, 3)
    coeffs = coeffs.reshape(3 * Np, SH_C).astype(jnp.bfloat16)

    # Per-ray data packed into one [8, Rp] array (rows 0-2 org, 3-5 dir).
    org_t = rays_o.astype(f32).T                                         # [3, R]
    dir_t = rays_d.astype(f32).T
    ray_pack = jnp.concatenate([org_t, dir_t, jnp.zeros((2, R), f32)], axis=0)
    ray_pack = jnp.pad(ray_pack, ((0, 0), (0, Rp - R)))                  # [8, Rp]

    sh_t = evaluate_sh_basis(rays_d.astype(f32)).T                       # [C, R]
    sh_t = jnp.pad(sh_t, ((0, 0), (0, Rp - R))).astype(jnp.bfloat16)     # [C, Rp]

    out8 = pl.pallas_call(
        _render_kernel,
        out_shape=jax.ShapeDtypeStruct((8, Rp), f32),
        grid_spec=pltpu.PrefetchScalarGridSpec(
            num_scalar_prefetch=0,
            grid=(Rp // TR, Np // TN),
            in_specs=[
                pl.BlockSpec((TN, 3), lambda r, n: (n, 0)),
                pl.BlockSpec((TN, 8), lambda r, n: (n, 0)),
                pl.BlockSpec((3 * TN, SH_C), lambda r, n: (n, 0)),
                pl.BlockSpec((8, TR), lambda r, n: (0, r)),
                pl.BlockSpec((SH_C, TR), lambda r, n: (0, r)),
            ],
            out_specs=pl.BlockSpec((8, TR), lambda r, n: (0, r)),
        ),
        compiler_params=pltpu.CompilerParams(
            dimension_semantics=("parallel", "arbitrary")),
    )(pos, pts, coeffs, ray_pack, sh_t)

    return out8[0:3, :R], out8[4:5, :R]          # rgb [3,R], depth [1,R]


# ----------------------------------------------------------------------------
# Pure-JAX glue mirroring the PyTorch module
# ----------------------------------------------------------------------------
def evaluate_sh_basis(d, sh_degree=SH_DEGREE):
    x, y, z = d[:, 0], d[:, 1], d[:, 2]
    bands = [jnp.ones_like(x) * 0.282095]
    if sh_degree >= 1:
        bands += [y * 0.488603, z * 0.488603, x * 0.488603]
    if sh_degree >= 2:
        bands += [x * y * 1.092548, y * z * 1.092548,
                  (3.0 * z * z - 1.0) * 0.315392, x * z * 1.092548,
                  (x * x - y * y) * 0.546274]
    if sh_degree >= 3:
        bands += [y * (3.0 * x * x - y * y) * 0.590044, x * y * z * 2.890611,
                  y * (5.0 * z * z - 1.0) * 0.457046,
                  z * (5.0 * z * z - 3.0) * 0.373176,
                  x * (5.0 * z * z - 1.0) * 0.457046,
                  z * (x * x - y * y) * 1.445306,
                  x * (x * x - 3.0 * y * y) * 0.590044]
    return jnp.stack(bands, axis=-1)  # [R, C]


def init_params(key, num_points, num_convex_shapes, latent_dim,
                sh_degree=SH_DEGREE, init_radius=1.0):
    P = num_points // num_convex_shapes
    K = num_convex_shapes
    keys = jax.random.split(key, 8)
    centers = jax.random.normal(keys[0], (K, 3), jnp.float32)
    phi = jax.random.uniform(keys[1], (K, P)) * 2.0 * np.pi
    theta = jnp.arccos(2.0 * jax.random.uniform(keys[2], (K, P)) - 1.0)
    x = init_radius * jnp.sin(theta) * jnp.cos(phi)
    y = init_radius * jnp.sin(theta) * jnp.sin(phi)
    z = init_radius * jnp.cos(theta)
    sphere = jnp.stack([x, y, z], axis=-1)               # [K, P, 3]
    positions = (sphere + centers[:, None, :]).reshape(K * P, 3)
    shape_indices = jnp.repeat(jnp.arange(K, dtype=jnp.int32), P)
    C = (sh_degree + 1) ** 2
    sh_coeffs = jnp.zeros((num_points, C, 3), jnp.float32).at[:, 0, :].set(0.5)
    params = dict(
        positions=positions,
        shape_indices=shape_indices,
        log_delta=-jnp.ones((K,), jnp.float32),
        log_sigma=jnp.zeros((K,), jnp.float32),
        raw_opacity=jax.random.uniform(keys[3], (num_points,),
                                       minval=-0.1, maxval=0.1),
        sh_coeffs=sh_coeffs,
        # latent_to_params MLP: latent_dim -> 256 -> 256 -> 2K
        w1=0.02 * jax.random.normal(keys[4], (latent_dim, 256)),
        b1=jnp.zeros((256,), jnp.float32),
        w2=0.02 * jax.random.normal(keys[5], (256, 256)),
        b2=jnp.zeros((256,), jnp.float32),
        w3=0.02 * jax.random.normal(keys[6], (256, 2 * K)),
        b3=jnp.zeros((2 * K,), jnp.float32),
    )
    return params


def _apply_latent(params, latent_code):
    # TODO(synk): the tiny latent->params MLP stays in plain JAX glue.
    lc = latent_code[0:1]
    h = jax.nn.leaky_relu(lc @ params['w1'] + params['b1'], 0.2)
    h = jax.nn.leaky_relu(h @ params['w2'] + params['b2'], 0.2)
    out = h @ params['w3'] + params['b3']                # [1, 2K]
    K = params['log_delta'].shape[0]
    delta_mod, sigma_mod = out[:, :K], out[:, K:]
    log_delta = params['log_delta'] + delta_mod[0] * 0.1
    log_sigma = params['log_sigma'] + sigma_mod[0] * 0.1
    return log_delta, log_sigma


def _camera_rays(camera_to_world, resolution):
    B = camera_to_world.shape[0]
    H, W = resolution
    i_vals = jnp.linspace(0.5, W - 0.5, W)
    j_vals = jnp.linspace(0.5, H - 0.5, H)
    i, j = jnp.meshgrid(i_vals, j_vals, indexing='ij')   # [W, H]
    x = (i - W / 2) / max(H, W)
    y = -(j - H / 2) / max(H, W)
    z = -jnp.ones_like(x)
    dirs = jnp.stack([x, y, z], axis=-1).reshape(1, -1, 3)
    dirs = jnp.broadcast_to(dirs, (B, H * W, 3))
    rays_o = jnp.broadcast_to(camera_to_world[:, :3, 3][:, None, :],
                              (B, H * W, 3))
    rays_d = jnp.einsum('bik,bpk->bpi', camera_to_world[:, :3, :3], dirs)
    return rays_o.reshape(-1, 3), rays_d.reshape(-1, 3)


def _render_points_ref(positions, point_delta, point_sigma, opacity,
                       sh_coeffs, rays_o, rays_d):
    """Pure-JAX reference matching the PyTorch render_points exactly."""
    sh_eval = evaluate_sh_basis(rays_d)                               # [R, C]
    rgb = jax.nn.sigmoid(jnp.einsum('ncq,rc->nrq', sh_coeffs, sh_eval))
    rel = positions[:, None, :] - rays_o[None, :, :]                  # [N,R,3]
    dist = jnp.linalg.norm(rel, axis=2, keepdims=True)
    dirp = rel / (dist + 1e-8)
    dot = jnp.sum(dirp * rays_d[None], axis=2)
    contrib = (jnp.exp(-point_delta[:, None] * (1.0 - dot) ** 2)
               * point_sigma[:, None] * opacity[:, None]
               / (dist[..., 0] + 1e-6))
    total = contrib.sum(0, keepdims=True)
    norm = contrib / (total + 1e-8)
    final = (rgb * norm[..., None]).sum(0)                            # [R,3]
    depth = (dist[..., 0] * norm).sum(0)[:, None]                     # [R,1]
    return final, depth


def latent_pointcloud_nerf_forward(params, camera_to_world, latent_code=None,
                                   resolution=(8, 8), use_pallas=True):
    B = camera_to_world.shape[0]
    H, W = resolution

    log_delta, log_sigma = params['log_delta'], params['log_sigma']
    if latent_code is not None:
        log_delta, log_sigma = _apply_latent(params, latent_code)

    rays_o, rays_d = _camera_rays(camera_to_world, resolution)
    nrm = jnp.linalg.norm(rays_d, axis=-1, keepdims=True)
    rays_d = rays_d / jnp.maximum(nrm, 1e-12)            # F.normalize

    opacity = jax.nn.sigmoid(params['raw_opacity'])
    point_delta = jnp.exp(log_delta)[params['shape_indices']]
    point_sigma = jnp.exp(log_sigma)[params['shape_indices']]

    if use_pallas:
        # sigma * opacity hoisted out of the N x R hot path.
        point_weight = point_sigma * opacity
        rgb3, depth1 = render_points_pallas(
            params['positions'], point_delta, point_weight,
            params['sh_coeffs'], rays_o, rays_d)
        rgb = rgb3.reshape(3, B, H, W).transpose(1, 0, 2, 3)      # [B,3,H,W]
        depth = depth1.reshape(1, B, H, W).transpose(1, 0, 2, 3)  # [B,1,H,W]
    else:
        rgb_r, depth_r = _render_points_ref(
            params['positions'], point_delta, point_sigma, opacity,
            params['sh_coeffs'], rays_o, rays_d)
        rgb = rgb_r.reshape(B, H, W, 3).transpose(0, 3, 1, 2)
        depth = depth_r.reshape(B, H, W, 1).transpose(0, 3, 1, 2)
    return {'rgb': rgb, 'depth': depth}


# ----------------------------------------------------------------------------
if __name__ == "__main__":
    key = jax.random.PRNGKey(0)
    k_param, k_lat = jax.random.split(key)

    resolution = (8, 8)
    num_points = 128
    num_convex_shapes = 16
    latent_dim = 64
    B = 2

    params = init_params(k_param, num_points, num_convex_shapes, latent_dim)

    c2w = jnp.tile(jnp.eye(4, dtype=jnp.float32)[None], (B, 1, 1))
    c2w = c2w.at[0, :3, 3].set(jnp.array([0.0, 0.0, 3.0], jnp.float32))
    c2w = c2w.at[1, :3, 3].set(jnp.array([0.5, 0.2, 2.5], jnp.float32))

    latent_code = 0.1 * jax.random.normal(k_lat, (B, latent_dim), jnp.float32)

    out = latent_pointcloud_nerf_forward(params, c2w, latent_code,
                                         resolution, use_pallas=True)
    jax.block_until_ready(out)

    ref = latent_pointcloud_nerf_forward(params, c2w, latent_code,
                                         resolution, use_pallas=False)
    jax.block_until_ready(ref)

    assert out['rgb'].shape == (B, 3, resolution[0], resolution[1])
    assert out['depth'].shape == (B, 1, resolution[0], resolution[1])
    np.testing.assert_allclose(np.asarray(out['rgb']), np.asarray(ref['rgb']),
                               rtol=2e-3, atol=2e-3)
    np.testing.assert_allclose(np.asarray(out['depth']),
                               np.asarray(ref['depth']),
                               rtol=2e-3, atol=2e-3)
    print("KERNEL_OK")
</pallas_src>

<mosaic_0001>
module attributes {stable_mosaic.version = 11 : i64} {
  func.func @_render_kernel(%arg0: i32, %arg1: i32, %arg2: memref<128x3xf32, #tpu.memory_space<vmem>>, %arg3: memref<128x8xf32, #tpu.memory_space<vmem>>, %arg4: memref<384x16xbf16, #tpu.memory_space<vmem>>, %arg5: memref<8x128xf32, #tpu.memory_space<vmem>>, %arg6: memref<16x128xbf16, #tpu.memory_space<vmem>>, %arg7: memref<8x128xf32, #tpu.memory_space<vmem>>) attributes {dimension_semantics = [#tpu.dimension_semantics<parallel>, #tpu.dimension_semantics<arbitrary>], iteration_bounds = array<i64: 1, 1>, scalar_prefetch = 0 : i64, scratch_operands = 0 : i64, tpu.core_type = #tpu.core_type<tc>, window_params = [{transform_indices = @transform_0, window_bounds = array<i64: 128, 3>}, {transform_indices = @transform_1, window_bounds = array<i64: 128, 8>}, {transform_indices = @transform_2, window_bounds = array<i64: 384, 16>}, {transform_indices = @transform_3, window_bounds = array<i64: 8, 128>}, {transform_indices = @transform_4, window_bounds = array<i64: 16, 128>}, {transform_indices = @transform_5, window_bounds = array<i64: 8, 128>}]} {
    %c0_i32 = arith.constant 0 : i32
    %0 = arith.cmpi eq, %arg1, %c0_i32 : i32
    %1 = arith.extui %0 : i1 to i32
    %c0_i32_0 = arith.constant 0 : i32
    %2 = arith.cmpi ne, %1, %c0_i32_0 : i32
    scf.if %2 {
      %cst_31 = arith.constant 0.000000e+00 : f32
      %93 = vector.broadcast %cst_31 : f32 to vector<8x128xf32>
      %c0_32 = arith.constant 0 : index
      %c0_33 = arith.constant 0 : index
      %94 = vector.load %arg7[%c0_32, %c0_33] : memref<8x128xf32, #tpu.memory_space<vmem>>, vector<8x128xf32>
      tpu.vector_store %arg7[%c0_32, %c0_33], %93 {strides = array<i32>} : memref<8x128xf32, #tpu.memory_space<vmem>>, vector<8x128xf32>,
    } else {
    }
    %c0 = arith.constant 0 : index
    %c0_1 = arith.constant 0 : index
    %3 = vector.load %arg5[%c0, %c0_1] : memref<8x128xf32, #tpu.memory_space<vmem>>, vector<8x128xf32>
    %c0_2 = arith.constant 0 : index
    %c0_3 = arith.constant 0 : index
    %4 = vector.load %arg6[%c0_2, %c0_3] : memref<16x128xbf16, #tpu.memory_space<vmem>>, vector<16x128xbf16>
    %c0_4 = arith.constant 0 : index
    %c0_5 = arith.constant 0 : index
    %5 = vector.load %arg2[%c0_4, %c0_5] : memref<128x3xf32, #tpu.memory_space<vmem>>, vector<128x3xf32>
    %c0_6 = arith.constant 0 : index
    %c0_7 = arith.constant 0 : index
    %6 = vector.load %arg3[%c0_6, %c0_7] : memref<128x8xf32, #tpu.memory_space<vmem>>, vector<128x1xf32>
    %c0_8 = arith.constant 0 : index
    %c1 = arith.constant 1 : index
    %7 = vector.load %arg3[%c0_8, %c1] : memref<128x8xf32, #tpu.memory_space<vmem>>, vector<128x1xf32>
    %cst = arith.constant 0.000000e+00 : f32
    %8 = vector.broadcast %cst : f32 to vector<128x128xf32>
    %cst_9 = arith.constant 0.000000e+00 : f32
    %9 = vector.broadcast %cst_9 : f32 to vector<128x128xf32>
    %10 = vector.extract_strided_slice %5 {offsets = [0, 0], sizes = [128, 1], strides = [1, 1]} : vector<128x3xf32> to vector<128x1xf32>
    %11 = vector.extract_strided_slice %3 {offsets = [0, 0], sizes = [1, 128], strides = [1, 1]} : vector<8x128xf32> to vector<1x128xf32>
    %12 = vector.broadcast %10 : vector<128x1xf32> to vector<128x128xf32>
    %13 = vector.broadcast %11 : vector<1x128xf32> to vector<128x128xf32>
    %14 = arith.subf %12, %13 : vector<128x128xf32>
    %15 = arith.mulf %14, %14 : vector<128x128xf32>
    %16 = arith.addf %8, %15 : vector<128x128xf32>
    %17 = vector.extract_strided_slice %3 {offsets = [3, 0], sizes = [1, 128], strides = [1, 1]} : vector<8x128xf32> to vector<1x128xf32>
    %18 = vector.broadcast %17 : vector<1x128xf32> to vector<128x128xf32>
    %19 = arith.mulf %14, %18 : vector<128x128xf32>
    %20 = arith.addf %9, %19 : vector<128x128xf32>
    %21 = vector.extract_strided_slice %5 {offsets = [0, 1], sizes = [128, 1], strides = [1, 1]} : vector<128x3xf32> to vector<128x1xf32>
    %22 = vector.extract_strided_slice %3 {offsets = [1, 0], sizes = [1, 128], strides = [1, 1]} : vector<8x128xf32> to vector<1x128xf32>
    %23 = vector.broadcast %21 : vector<128x1xf32> to vector<128x128xf32>
    %24 = vector.broadcast %22 : vector<1x128xf32> to vector<128x128xf32>
    %25 = arith.subf %23, %24 : vector<128x128xf32>
    %26 = arith.mulf %25, %25 : vector<128x128xf32>
    %27 = arith.addf %16, %26 : vector<128x128xf32>
    %28 = vector.extract_strided_slice %3 {offsets = [4, 0], sizes = [1, 128], strides = [1, 1]} : vector<8x128xf32> to vector<1x128xf32>
    %29 = vector.broadcast %28 : vector<1x128xf32> to vector<128x128xf32>
    %30 = arith.mulf %25, %29 : vector<128x128xf32>
    %31 = arith.addf %20, %30 : vector<128x128xf32>
    %32 = vector.extract_strided_slice %5 {offsets = [0, 2], sizes = [128, 1], strides = [1, 1]} : vector<128x3xf32> to vector<128x1xf32>
    %33 = vector.extract_strided_slice %3 {offsets = [2, 0], sizes = [1, 128], strides = [1, 1]} : vector<8x128xf32> to vector<1x128xf32>
    %34 = vector.broadcast %32 : vector<128x1xf32> to vector<128x128xf32>
    %35 = vector.broadcast %33 : vector<1x128xf32> to vector<128x128xf32>
    %36 = arith.subf %34, %35 : vector<128x128xf32>
    %37 = arith.mulf %36, %36 : vector<128x128xf32>
    %38 = arith.addf %27, %37 : vector<128x128xf32>
    %39 = vector.extract_strided_slice %3 {offsets = [5, 0], sizes = [1, 128], strides = [1, 1]} : vector<8x128xf32> to vector<1x128xf32>
    %40 = vector.broadcast %39 : vector<1x128xf32> to vector<128x128xf32>
    %41 = arith.mulf %36, %40 : vector<128x128xf32>
    %42 = arith.addf %31, %41 : vector<128x128xf32>
    %cst_10 = arith.constant 9.99999996E-13 : f32
    %43 = vector.broadcast %cst_10 : f32 to vector<128x128xf32>
    %44 = arith.addf %38, %43 : vector<128x128xf32>
    %45 = math.rsqrt %44 : vector<128x128xf32>
    %46 = arith.mulf %38, %45 : vector<128x128xf32>
    %47 = arith.mulf %42, %45 : vector<128x128xf32>
    %cst_11 = arith.constant 0.000000e+00 : f32
    %48 = vector.broadcast %cst_11 : f32 to vector<128x1xf32>
    %49 = arith.subf %48, %6 : vector<128x1xf32>
    %cst_12 = arith.constant 1.000000e+00 : f32
    %50 = vector.broadcast %cst_12 : f32 to vector<128x128xf32>
    %51 = arith.subf %50, %47 : vector<128x128xf32>
    %52 = arith.mulf %51, %51 : vector<128x128xf32>
    %53 = vector.broadcast %49 : vector<128x1xf32> to vector<128x128xf32>
    %54 = arith.mulf %53, %52 : vector<128x128xf32>
    %55 = math.exp %54 : vector<128x128xf32>
    %56 = vector.broadcast %7 : vector<128x1xf32> to vector<128x128xf32>
    %57 = arith.mulf %55, %56 : vector<128x128xf32>
    %58 = arith.mulf %57, %45 : vector<128x128xf32>
    %c0_13 = arith.constant 0 : index
    %c0_14 = arith.constant 0 : index
    %59 = vector.load %arg4[%c0_13, %c0_14] : memref<384x16xbf16, #tpu.memory_space<vmem>>, vector<384x16xbf16>
    %cst_15 = arith.constant dense<0.000000e+00> : vector<384x128xf32>
    %60 = tpu.matmul %59, %4, %cst_15 {dimension_numbers = #tpu.dot_dimension_numbers<[1], [0], [0], [1], [0, 0, 1, 1], [], []>} : vector<384x16xbf16>, vector<16x128xbf16>, vector<384x128xf32> -> vector<384x128xf32>
    %cst_16 = arith.constant 5.000000e-01 : f32
    %61 = vector.broadcast %cst_16 : f32 to vector<384x128xf32>
    %62 = arith.mulf %61, %60 : vector<384x128xf32>
    %63 = math.tanh %62 : vector<384x128xf32>
    %cst_17 = arith.constant 5.000000e-01 : f32
    %64 = vector.broadcast %cst_17 : f32 to vector<384x128xf32>
    %65 = arith.mulf %64, %63 : vector<384x128xf32>
    %cst_18 = arith.constant 5.000000e-01 : f32
    %66 = vector.broadcast %cst_18 : f32 to vector<384x128xf32>
    %67 = arith.addf %65, %66 : vector<384x128xf32>
    %68 = vector.extract_strided_slice %67 {offsets = [0, 0], sizes = [128, 128], strides = [1, 1]} : vector<384x128xf32> to vector<128x128xf32>
    %69 = arith.mulf %68, %58 : vector<128x128xf32>
    %cst_19 = arith.constant dense<0.000000e+00> : vector<128xf32>
    %70 = vector.multi_reduction <add>, %69, %cst_19 [0] : vector<128x128xf32> to vector<128xf32>
    %71 = vector.shape_cast %70 : vector<128xf32> to vector<1x128xf32>
    %72 = vector.extract_strided_slice %67 {offsets = [128, 0], sizes = [128, 128], strides = [1, 1]} : vector<384x128xf32> to vector<128x128xf32>
    %73 = arith.mulf %72, %58 : vector<128x128xf32>
    %cst_20 = arith.constant dense<0.000000e+00> : vector<128xf32>
    %74 = vector.multi_reduction <add>, %73, %cst_20 [0] : vector<128x128xf32> to vector<128xf32>
    %75 = vector.shape_cast %74 : vector<128xf32> to vector<1x128xf32>
    %76 = vector.extract_strided_slice %67 {offsets = [256, 0], sizes = [128, 128], strides = [1, 1]} : vector<384x128xf32> to vector<128x128xf32>
    %77 = arith.mulf %76, %58 : vector<128x128xf32>
    %cst_21 = arith.constant dense<0.000000e+00> : vector<128xf32>
    %78 = vector.multi_reduction <add>, %77, %cst_21 [0] : vector<128x128xf32> to vector<128xf32>
    %79 = vector.shape_cast %78 : vector<128xf32> to vector<1x128xf32>
    %cst_22 = arith.constant dense<0.000000e+00> : vector<128xf32>
    %80 = vector.multi_reduction <add>, %58, %cst_22 [0] : vector<128x128xf32> to vector<128xf32>
    %81 = vector.shape_cast %80 : vector<128xf32> to vector<1x128xf32>
    %82 = arith.mulf %46, %58 : vector<128x128xf32>
    %cst_23 = arith.constant dense<0.000000e+00> : vector<128xf32>
    %83 = vector.multi_reduction <add>, %82, %cst_23 [0] : vector<128x128xf32> to vector<128xf32>
    %84 = vector.shape_cast %83 : vector<128xf32> to vector<1x128xf32>
    %cst_24 = arith.constant 0.000000e+00 : f32
    %85 = vector.broadcast %cst_24 : f32 to vector<3x128xf32>
    %c0_25 = arith.constant 0 : index
    %c0_26 = arith.constant 0 : index
    %86 = vector.load %arg7[%c0_25, %c0_26] : memref<8x128xf32, #tpu.memory_space<vmem>>, vector<8x128xf32>
    %87 = tpu.concatenate %71, %75, %79, %81, %84, %85 in 0 : vector<1x128xf32>, vector<1x128xf32>, vector<1x128xf32>, vector<1x128xf32>, vector<1x128xf32>, vector<3x128xf32> -> vector<8x128xf32>
    %88 = arith.addf %86, %87 : vector<8x128xf32>
    %c0_27 = arith.constant 0 : index
    %c0_28 = arith.constant 0 : index
    %89 = vector.load %arg7[%c0_27, %c0_28] : memref<8x128xf32, #tpu.memory_space<vmem>>, vector<8x128xf32>
    tpu.vector_store %arg7[%c0_27, %c0_28], %88 {strides = array<i32>} : memref<8x128xf32, #tpu.memory_space<vmem>>, vector<8x128xf32>,
    %c0_i32_29 = arith.constant 0 : i32
    %90 = arith.cmpi eq, %arg1, %c0_i32_29 : i32
    %91 = arith.extui %90 : i1 to i32
    %c0_i32_30 = arith.constant 0 : i32
    %92 = arith.cmpi ne, %91, %c0_i32_30 : i32
    scf.if %92 {
      %c0_31 = arith.constant 0 : index
      %c0_32 = arith.constant 0 : index
      %93 = vector.load %arg7[%c0_31, %c0_32] : memref<8x128xf32, #tpu.memory_space<vmem>>, vector<8x128xf32>
      %94 = vector.extract_strided_slice %93 {offsets = [3, 0], sizes = [1, 128], strides = [1, 1]} : vector<8x128xf32> to vector<1x128xf32>
      %cst_33 = arith.constant 9.99999993E-9 : f32
      %95 = vector.broadcast %cst_33 : f32 to vector<1x128xf32>
      %96 = arith.addf %94, %95 : vector<1x128xf32>
      %cst_34 = arith.constant 1.000000e+00 : f32
      %97 = vector.broadcast %cst_34 : f32 to vector<1x128xf32>
      %98 = arith.divf %97, %96 : vector<1x128xf32>
      %99 = vector.extract_strided_slice %93 {offsets = [0, 0], sizes = [3, 128], strides = [1, 1]} : vector<8x128xf32> to vector<3x128xf32>
      %100 = vector.broadcast %98 : vector<1x128xf32> to vector<3x128xf32>
      %101 = arith.mulf %99, %100 : vector<3x128xf32>
      %102 = vector.extract_strided_slice %93 {offsets = [3, 0], sizes = [1, 128], strides = [1, 1]} : vector<8x128xf32> to vector<1x128xf32>
      %103 = vector.extract_strided_slice %93 {offsets = [4, 0], sizes = [1, 128], strides = [1, 1]} : vector<8x128xf32> to vector<1x128xf32>
      %104 = arith.mulf %103, %98 : vector<1x128xf32>
      %105 = vector.extract_strided_slice %93 {offsets = [5, 0], sizes = [3, 128], strides = [1, 1]} : vector<8x128xf32> to vector<3x128xf32>
      %106 = tpu.concatenate %101, %102, %104, %105 in 0 : vector<3x128xf32>, vector<1x128xf32>, vector<1x128xf32>, vector<3x128xf32> -> vector<8x128xf32>
      %c0_35 = arith.constant 0 : index
      %c0_36 = arith.constant 0 : index
      %107 = vector.load %arg7[%c0_35, %c0_36] : memref<8x128xf32, #tpu.memory_space<vmem>>, vector<8x128xf32>
      tpu.vector_store %arg7[%c0_35, %c0_36], %106 {strides = array<i32>} : memref<8x128xf32, #tpu.memory_space<vmem>>, vector<8x128xf32>,
    } else {
    }
    return
  }
  func.func @transform_0(%arg0: i32, %arg1: i32) -> (i32, i32) {
    %c0_i32 = arith.constant 0 : i32
    %c0_i32_0 = arith.constant 0 : i32
    return %arg1, %c0_i32 : i32, i32
  }
  func.func @transform_1(%arg0: i32, %arg1: i32) -> (i32, i32) {
    %c0_i32 = arith.constant 0 : i32
    %c0_i32_0 = arith.constant 0 : i32
    return %arg1, %c0_i32 : i32, i32
  }
  func.func @transform_2(%arg0: i32, %arg1: i32) -> (i32, i32) {
    %c0_i32 = arith.constant 0 : i32
    %c0_i32_0 = arith.constant 0 : i32
    return %arg1, %c0_i32 : i32, i32
  }
  func.func @transform_3(%arg0: i32, %arg1: i32) -> (i32, i32) {
    %c0_i32 = arith.constant 0 : i32
    %c0_i32_0 = arith.constant 0 : i32
    return %c0_i32, %arg0 : i32, i32
  }
  func.func @transform_4(%arg0: i32, %arg1: i32) -> (i32, i32) {
    %c0_i32 = arith.constant 0 : i32
    %c0_i32_0 = arith.constant 0 : i32
    return %c0_i32, %arg0 : i32, i32
  }
  func.func @transform_5(%arg0: i32, %arg1: i32) -> (i32, i32) {
    %c0_i32 = arith.constant 0 : i32
    %c0_i32_0 = arith.constant 0 : i32
    return %c0_i32, %arg0 : i32, i32
  }
}

</mosaic_0001>

<bundles_post_ra>
// kernel: tpu_custom_call.1
= control target key start
LH: loop header
LB: loop body
LE: loop exit
PB: predicated region body
PF: predicated region fallthrough
CT: control target
= control target key end

     0   :  { %v2119_v2 = vmov 1   ;;  %v2120_v3 = vmov 0   ;;  %vm1060_vm0 = vcmask 130048   ;;  %v2121_v29 = vmov 2   ;;  %s3126_s0 = inlined_call_operand.vmem [shape: f32[128,3], index: 0, kind: input, shape index: {}]   ;;  %s3127_s1 = inlined_call_operand.vmem [shape: f32[128,8], index: 1, kind: input, shape index: {}]   ;;  %s3128_s2 = inlined_call_operand.vmem [shape: bf16[384,16], index: 2, kind: input, shape index: {}]   ;;  %s3129_s3 = inlined_call_operand.vmem [shape: f32[8,128], index: 3, kind: input, shape index: {}]   ;;  %s3130_s4 = inlined_call_operand.vmem [shape: bf16[16,128], index: 4, kind: input, shape index: {}]   ;;  %s3131_s5 = inlined_call_operand.hbm [shape: f32[8,128], index: 5, kind: output, shape index: {}]  }
   0x1   :  { %v2156_v0 = vld [vmem:[%s3126_s0 + $0x10] sm:$0xff]  ;;  %v2161_v1 = vld [vmem:[%s3126_s0] sm:$0xff]  ;;  %1898 = vset.pattern.permute.xlu0 %v2119_v2  ;;  %1897 = vset.pattern.permute.xlu1 %v2120_v3  ;;  %v2176_v6 = vld [vmem:[%s3126_s0 + $0x18] sm:$0xff] }
   0x2   :  { %v1910_v4 = vld [vmem:[%s3130_s4] sm:$0xff]   ;;  %74 = vperm.xlu1 %1897, %v2156_v0   ;;  %231 = vperm.xlu0 %1898, %v2161_v1   ;;  %v1912_v7 = vld [vmem:[%s3128_s2 + $0x8] sm:$0xff]   ;;  %v1914_v10 = vld [vmem:[%s3128_s2 + $0x10] sm:$0xff]  }
   0x3   :  { %v1911_v5 = vld [vmem:[%s3128_s2] sm:$0xff]   ;;  %1840 = vmatprep.subr.bf16.mxu0 %v1910_v4  ;;  %1890 = vmatprep.subr.bf16.mxu1 %v1910_v4  ;;  %v2185_v8 = vld [vmem:[%s3126_s0 + $0x28] sm:$0xff]  ;;  %v1917_v12 = vld [vmem:[%s3128_s2 + $0x70] sm:$0xff]  }
   0x4   :  { %1841 = vmatpush3.bf16.msra.mxu0 %v1910_v4  ;;  %1842 = vmatprep.mubr.msk.bf16.mxu0 %vm1060_vm0, %v1911_v5  ;;  %v1913_v9 = vld [vmem:[%s3128_s2 + $0x60] sm:$0xff]   ;;  %v1915_v11 = vld [vmem:[%s3128_s2 + $0x68] sm:$0xff]   ;;  %v37_v13 = vld [vmem:[%s3126_s0 + $0x38] sm:$0xff] }
   0x5   :  { %1891 = vmatpush3.bf16.msra.mxu1 %v1910_v4  ;;  %1866 = vmatprep.mubr.msk.bf16.mxu1 %vm1060_vm0, %v1913_v9  ;;  %v1916_v14 = vld [vmem:[%s3128_s2 + $0x18] sm:$0xff]   ;;  %v1918_v15 = vld [vmem:[%s3128_s2 + $0x20] sm:$0xff]   ;;  %v39_v17 = vld [vmem:[%s3126_s0 + $0x48] sm:$0xff] }
   0x6   :  { %79 = vperm.xlu1 %1897, %v2176_v6   ;;  %243 = vperm.xlu0 %1898, %v2176_v6   ;;  %v1919_v16 = vld [vmem:[%s3128_s2 + $0x78] sm:$0xff]   ;;  %v1921_v18 = vld [vmem:[%s3128_s2 + $0x80] sm:$0xff]   ;;  %v1920_v20 = vld [vmem:[%s3128_s2 + $0x28] sm:$0xff]  }
   0x7   :  { %1843 = vmatmul.mubr.msk.bf16.vlgmr.msra.gmra.mxu0 %vm1060_vm0, %v1912_v7  ;;  %v41_v19 = vld [vmem:[%s3126_s0 + $0x58] sm:$0xff]  ;;  %v1922_v21 = vld [vmem:[%s3128_s2 + $0x30] sm:$0xff]   ;;  %v1923_v22 = vld [vmem:[%s3128_s2 + $0x88] sm:$0xff]  }
   0x8   :  { %1846 = vmatprep.mubr.msk.bf16.mxu0 %vm1060_vm0, %v1914_v10  ;;  %1867 = vmatmul.mubr.msk.bf16.vlgmr.msra.gmra.mxu1 %vm1060_vm0, %v1915_v11  ;;  %v43_v23 = vld [vmem:[%s3126_s0 + $0x68] sm:$0xff]  ;;  %v1927_v24 = vld [vmem:[%s3128_s2 + $0x90] sm:$0xff]   ;;  %v2254_v25 = vld [vmem:[%s3126_s0 + $0x78] sm:$0xff] }
   0x9   :  { %1870 = vmatprep.mubr.msk.bf16.mxu1 %vm1060_vm0, %v1917_v12  ;;  %v1924_v26 = vld [vmem:[%s3128_s2 + $0x38] sm:$0xff]   ;;  %v1925_v27 = vld [vmem:[%s3128_s2 + $0x40] sm:$0xff]   ;;  %v31_v31 = vld [vmem:[%s3126_s0 + $0x8] sm:$0xff] }
   0xa   :  { %89 = vperm.xlu1 %1897, %v2185_v8   ;;  %251 = vperm.xlu0 %1898, %v2185_v8   ;;  %v1928_v28 = vld [vmem:[%s3128_s2 + $0x98] sm:$0xff]   ;;  %v1931_v30 = vld [vmem:[%s3128_s2 + $0xa0] sm:$0xff]   ;;  %v1926_v32 = vld [vmem:[%s3128_s2 + $0x48] sm:$0xff]  }
   0xe   :  { %99 = vperm.xlu1 %1897, %v37_v13   ;;  %259 = vperm.xlu0 %1898, %v37_v13  }
   0xf   :  { %1847 = vmatmul.mubr.msk.bf16.gmra.mxu0 %vm1060_vm0, %v1916_v14 }
  0x10   :  { %1850 = vmatprep.mubr.msk.bf16.mxu0 %vm1060_vm0, %v1918_v15  ;;  %1871 = vmatmul.mubr.msk.bf16.gmra.mxu1 %vm1060_vm0, %v1919_v16 }
  0x11   :  { %1874 = vmatprep.mubr.msk.bf16.mxu1 %vm1060_vm0, %v1921_v18 }
  0x12   :  { %109 = vperm.xlu1 %1897, %v39_v17   ;;  %267 = vperm.xlu0 %1898, %v39_v17  }
  0x16   :  { %119 = vperm.xlu1 %1897, %v41_v19   ;;  %275 = vperm.xlu0 %1898, %v41_v19  }
  0x17   :  { %1851 = vmatmul.mubr.msk.bf16.gmra.mxu0 %vm1060_vm0, %v1920_v20 }
  0x18   :  { %1854 = vmatprep.mubr.msk.bf16.mxu0 %vm1060_vm0, %v1922_v21  ;;  %1875 = vmatmul.mubr.msk.bf16.gmra.mxu1 %vm1060_vm0, %v1923_v22 }
  0x19   :  { %1878 = vmatprep.mubr.msk.bf16.mxu1 %vm1060_vm0, %v1927_v24 }
  0x1a   :  { %129 = vperm.xlu1 %1897, %v43_v23   ;;  %283 = vperm.xlu0 %1898, %v43_v23  }
  0x1e   :  { %139 = vperm.xlu1 %1897, %v2254_v25   ;;  %1900 = vset.pattern.permute.xlu0 %v2121_v29 }
  0x1f   :  { %383 = vperm.xlu0 %1900, %v2161_v1   ;;  %1855 = vmatmul.mubr.msk.bf16.gmra.mxu0 %vm1060_vm0, %v1924_v26 }
  0x20   :  { %1858 = vmatprep.mubr.msk.bf16.mxu0 %vm1060_vm0, %v1925_v27  ;;  %1879 = vmatmul.mubr.msk.bf16.gmra.mxu1 %vm1060_vm0, %v1928_v28 }
  0x21   :  { %1882 = vmatprep.mubr.msk.bf16.mxu1 %vm1060_vm0, %v1931_v30 }
  0x22   :  { %1899 = vset.pattern.permute.xlu1 %v2119_v2 }
  0x23   :  { %235 = vperm.xlu1 %1899, %v31_v31   ;;  %395 = vperm.xlu0 %1900, %v2176_v6  }
  0x24   :  { %10 = vsyncpa [#allocation3], 0  ;;  %v1929_v33 = vld [vmem:[%s3128_s2 + $0x50] sm:$0xff]   ;;  %v1932_v34 = vld [vmem:[%s3128_s2 + $0xa8] sm:$0xff]   ;;  %v142_v63 = vlaneseq  ;;  %vm1720_vm1 = vcmask 1040384   ;;  %vm1722_vm2 = vcmask 1041408  }
  0x25   :  { %v1933_v35 = vld [vmem:[%s3128_s2 + $0xb0] sm:$0xff]   ;;  %v34_v36 = vld [vmem:[%s3126_s0 + $0x20] sm:$0xff]  ;;  %v1930_v38 = vld [vmem:[%s3128_s2 + $0x58] sm:$0xff]   ;;  %vm1724_vm3 = vcmask 1042432   ;;  %vm1726_vm4 = vcmask 1043456   ;;  %vm1728_vm5 = vcmask 1044480  }
  0x26   :  { %v36_v37 = vld [vmem:[%s3126_s0 + $0x30] sm:$0xff]  ;;  %v1934_v39 = vld [vmem:[%s3128_s2 + $0xb8] sm:$0xff]   ;;  %v38_v40 = vld [vmem:[%s3126_s0 + $0x40] sm:$0xff] }
  0x27   :  { %239 = vperm.xlu1 %1899, %v2156_v0   ;;  %403 = vperm.xlu0 %1900, %v2185_v8   ;;  %v40_v41 = vld [vmem:[%s3126_s0 + $0x50] sm:$0xff]  ;;  %v42_v42 = vld [vmem:[%s3126_s0 + $0x60] sm:$0xff]  ;;  %v49_v46 = vld [vmem:[%s3127_s1 + $0x18] sm:$0xff] }
  0x28   :  { %1859 = vmatmul.mubr.msk.bf16.gmra.mxu0 %vm1060_vm0, %v1926_v32  ;;  %1883 = vmatmul.mubr.msk.bf16.gmra.mxu1 %vm1060_vm0, %v1932_v34  ;;  %v44_v43 = vld [vmem:[%s3126_s0 + $0x70] sm:$0xff]  ;;  %v46_v44 = vld [vmem:[%s3127_s1] sm:$0xff]  ;;  %v601_v47 = vsub.f32 0.0, %v49_v46  ;;  %v51_v48 = vld [vmem:[%s3127_s1 + $0x28] sm:$0xff] }
  0x29   :  { %1862 = vmatprep.mubr.msk.bf16.mxu0 %vm1060_vm0, %v1929_v33  ;;  %1886 = vmatprep.mubr.msk.bf16.mxu1 %vm1060_vm0, %v1933_v35  ;;  %v598_v45 = vsub.f32 0.0, %v46_v44  ;;  %v603_v49 = vsub.f32 0.0, %v51_v48  ;;  %v47_v50 = vld [vmem:[%s3127_s1 + $0x8] sm:$0xff]  ;;  %v2347_v51 = vld [vmem:[%s3127_s1 + $0x38] sm:$0xff]  ;;  %v48_v54 = vld [vmem:[%s3127_s1 + $0x10] sm:$0xff] }
  0x2a   :  { %v599_v52 = vsub.f32 0.0, %v47_v50  ;;  %v605_v53 = vsub.f32 0.0, %v2347_v51  ;;  %v2357_v55 = vld [vmem:[%s3127_s1 + $0x48] sm:$0xff]  ;;  %v600_v56 = vsub.f32 0.0, %v48_v54  ;;  %v50_v58 = vld [vmem:[%s3127_s1 + $0x20] sm:$0xff]  ;;  %v52_v60 = vld [vmem:[%s3127_s1 + $0x30] sm:$0xff] }
  0x2b   :  { %247 = vperm.xlu1 %1899, %v34_v36   ;;  %411 = vperm.xlu0 %1900, %v37_v13   ;;  %v607_v57 = vsub.f32 0.0, %v2357_v55  ;;  %v602_v59 = vsub.f32 0.0, %v50_v58  ;;  %v604_v61 = vsub.f32 0.0, %v52_v60  ;;  %v2371_v62 = vld [vmem:[%s3127_s1 + $0x40] sm:$0xff]  ;;  %v2379_v4 = vld [vmem:[%s3127_s1 + $0x50] sm:$0xff]  ;;  %v2414_v21 = vld [vmem:[%s3127_s1 + $0x58] sm:$0xff] }
  0x2c   :  { %v608_v6 = vsub.f32 0.0, %v2379_v4  ;;  %v2390_v10 = vld [vmem:[%s3129_s3] sm:$0xff]  ;;  %v609_v28 = vsub.f32 0.0, %v2414_v21 }
  0x2d   :  { %v58_v33 = vld [vmem:[%s3127_s1 + $0x60] sm:$0xff] }
  0x2f   :  { %255 = vperm.xlu1 %1899, %v36_v37   ;;  %419 = vperm.xlu0 %1900, %v39_v17  }
  0x30   :  { %1863 = vmatmul.mubr.msk.bf16.gmra.mxu0 %vm1060_vm0, %v1930_v38  ;;  %1887 = vmatmul.mubr.msk.bf16.gmra.mxu1 %vm1060_vm0, %v1934_v39 }
  0x33   :  { %263 = vperm.xlu1 %1899, %v38_v40   ;;  %427 = vperm.xlu0 %1900, %v41_v19  }
  0x37   :  { %271 = vperm.xlu1 %1899, %v40_v41   ;;  %435 = vperm.xlu0 %1900, %v43_v23  }
  0x3b   :  { %279 = vperm.xlu1 %1899, %v42_v42   ;;  %439 = vperm.xlu0 %1900, %v44_v43  }
  0x3f   :  { %287 = vperm.xlu1 %1899, %v44_v43   ;;  %1903 = vset.pattern.permute.xlu0 %v2120_v3 }
  0x40   :  { %64 = vperm.xlu0 %1903, %v2161_v1   ;;  %v2374_v1 = vshrl.u32 %v142_v63, 7 }
  0x42   :  { %3142 = vst [vmem:[#allocation5_spill] sm:$0xff] %v2374_v1  ;;  %v296_v5 = vsub.s32 1, %v2374_v1  ;;  %v144_v7 = vsub.s32 0, %v2374_v1  ;;  %v348_v8 = vsub.s32 4, %v2374_v1  ;;  %v3132_v12 = vsub.s32 3, %v2374_v1 }
  0x43   :  { %1901 = vset.pattern.permute.xlu1 %v2121_v29 }
  0x44   :  { %387 = vperm.xlu1 %1901, %v31_v31   ;;  %69 = vperm.xlu0 %1903, %v31_v31   ;;  %v2396_v13 = vrot.slane %v2390_v10, %v296_v5  ;;  %v2399_v14 = vrot.slane %v2390_v10, %v144_v7  ;;  %v2402_v15 = vrot.slane %v2390_v10, %v348_v8 }
  0x45   :  { %v2407_v18 = vrot.slane %v2390_v10, %v3132_v12 }
  0x48   :  { %391 = vperm.xlu1 %1901, %v2156_v0   ;;  %84 = vperm.xlu0 %1903, %v34_v36   ;;  %v606_v0 = vsub.f32 0.0, %v2371_v62 }
  0x4c   :  { %399 = vperm.xlu1 %1901, %v34_v36   ;;  %94 = vperm.xlu0 %1903, %v36_v37  }
  0x50   :  { %407 = vperm.xlu1 %1901, %v36_v37   ;;  %104 = vperm.xlu0 %1903, %v38_v40  }
  0x54   :  { %415 = vperm.xlu1 %1901, %v38_v40   ;;  %114 = vperm.xlu0 %1903, %v40_v41   ;;  %v610_v40 = vsub.f32 0.0, %v58_v33 }
  0x58   :  { %423 = vperm.xlu1 %1901, %v40_v41   ;;  %124 = vperm.xlu0 %1903, %v42_v42  }
  0x5c   :  { %431 = vperm.xlu1 %1901, %v42_v42   ;;  %134 = vperm.xlu0 %1903, %v44_v43  }
  0x60   :  { %1902 = vset.pattern.permute.xlu1 %v2119_v2  ;;  %648 = vperm.xlu0 %1903, %v598_v45   ;;  %v2441_v45 = vld [vmem:[%s3127_s1 + $0x68] sm:$0xff] }
  0x61   :  { %291 = vperm.xlu1 %1902, %v2254_v25  }
  0x64   :  { %663 = vperm.xlu0 %1903, %v601_v47  }
  0x65   :  { %1904 = vset.pattern.permute.xlu1 %v2121_v29 }
  0x66   :  { %443 = vperm.xlu1 %1904, %v2254_v25  }
  0x68   :  { %673 = vperm.xlu0 %1903, %v603_v49  }
  0x6a   :  { %1905 = vset.pattern.permute.xlu1 %v2120_v3 }
  0x6b   :  { %653 = vperm.xlu1 %1905, %v599_v52   ;;  %v611_v52 = vsub.f32 0.0, %v2441_v45 }
  0x6c   :  { %683 = vperm.xlu0 %1903, %v605_v53  }
  0x6f   :  { %658 = vperm.xlu1 %1905, %v600_v56  }
  0x70   :  { %693 = vperm.xlu0 %1903, %v607_v57  }
  0x73   :  { %668 = vperm.xlu1 %1905, %v602_v59  }
  0x74   :  { %1906 = vset.pattern.permute.xlu0 %v2119_v2 }
  0x75   :  { %776 = vperm.xlu0 %1906, %v46_v44  }
  0x77   :  { %678 = vperm.xlu1 %1905, %v604_v61  }
  0x79   :  { %786 = vperm.xlu0 %1906, %v48_v54  }
  0x7b   :  { %688 = vperm.xlu1 %1905, %v606_v0  }
  0x7d   :  { %v2385_v9 = vpop.permute.xlu1 %74  ;;  %791 = vperm.xlu0 %1906, %v49_v46   ;;  %v2392_v11 = vpop.permute.xlu0 %231 }
  0x7f   :  { %698 = vperm.xlu1 %1905, %v608_v6  }
  0x81   :  { %v80_v16 = vpop.permute.xlu1 %79  ;;  %796 = vperm.xlu0 %1906, %v50_v58   ;;  %v244_v17 = vpop.permute.xlu0 %243  ;;  %v60_v58 = vld [vmem:[%s3127_s1 + $0x70] sm:$0xff] }
  0x82   :  { %v149_v19 = vsub.f32 %v80_v16, %v2399_v14  ;;  %v301_v20 = vsub.f32 %v244_v17, %v2396_v13  ;;  %v612_v5 = vsub.f32 0.0, %v60_v58  ;;  %v61_v17 = vld [vmem:[%s3127_s1 + $0x78] sm:$0xff]  ;;  %s2122_s1 = smov [#allocation2]  }
  0x83   :  { %1907 = vset.pattern.permute.xlu1 %v2119_v2  ;;  %s1758_s25 = sshll.u32 %s2122_s1, 4  ;;  %s1759_s25 = int_to_ptr.vmem [resolvable:$true] %s1758_s25 }
  0x84   :  { %v165_v22 = vmul.f32 %v149_v19, %v149_v19  ;;  %v201_v23 = vmul.f32 %v2407_v18, %v149_v19  ;;  %v317_v24 = vmul.f32 %v301_v20, %v301_v20  ;;  %v353_v25 = vmul.f32 %v2402_v15, %v301_v20  ;;  %781 = vperm.xlu1 %1907, %v47_v50   ;;  %s2097_s26 = scalar_lea.vmem %s1759_s25, 128  ;;  %p2102_p1 = scmp.lt.s32.totalorder %s1759_s25, %s1759_s25 }
  0x85   :  { %v90_v26 = vpop.permute.xlu1 %89  ;;  %801 = vperm.xlu0 %1906, %v51_v48   ;;  %v252_v27 = vpop.permute.xlu0 %251  ;;  %p2098_p0 = scmp.ne.s32.totalorder %s1759_s25, %s2097_s26  ;;  %p2103_p2 = scmp.lt.s32.totalorder %s2097_s26, %s2097_s26 }
  0x86   :  { %v2420_v29 = vadd.f32 %v317_v24, %v165_v22  ;;  %v2422_v30 = vadd.f32 %v353_v25, %v201_v23  ;;  %v151_v31 = vsub.f32 %v90_v26, %v2399_v14  ;;  %v303_v32 = vsub.f32 %v252_v27, %v2396_v13 }
  0x87   :  { %v613_v25 = vsub.f32 0.0, %v61_v17  ;;  %p2104_p3 = por %p2103_p2, %p2102_p1 }
  0x88   :  { %v167_v34 = vmul.f32 %v151_v31, %v151_v31  ;;  %v203_v35 = vmul.f32 %v2407_v18, %v151_v31  ;;  %v319_v36 = vmul.f32 %v303_v32, %v303_v32  ;;  %v355_v37 = vmul.f32 %v2402_v15, %v303_v32  ;;  %1908 = vset.pattern.permute.xlu1 %v2120_v3 }
  0x89   :  { %v100_v38 = vpop.permute.xlu1 %99  ;;  %703 = vperm.xlu1 %1908, %v609_v28   ;;  %806 = vperm.xlu0 %1906, %v52_v60   ;;  %v260_v39 = vpop.permute.xlu0 %259  ;;  %v448_v32 = vsub.s32 2, %v2374_v1  ;;  %p2105_p4 = pnand %p2104_p3, %p2098_p0 }
  0x8a   :  { %v2432_v41 = vadd.f32 %v319_v36, %v167_v34  ;;  %v2434_v42 = vadd.f32 %v355_v37, %v203_v35  ;;  %v153_v43 = vsub.f32 %v100_v38, %v2399_v14  ;;  %v305_v44 = vsub.f32 %v260_v39, %v2396_v13 }
  0x8c   :  { %v169_v46 = vmul.f32 %v153_v43, %v153_v43  ;;  %v205_v3 = vmul.f32 %v2407_v18, %v153_v43  ;;  %v321_v47 = vmul.f32 %v305_v44, %v305_v44  ;;  %v357_v48 = vmul.f32 %v2402_v15, %v305_v44 }
  0x8d   :  { %v110_v49 = vpop.permute.xlu1 %109  ;;  %708 = vperm.xlu1 %1908, %v610_v40   ;;  %816 = vperm.xlu0 %1906, %v2371_v62   ;;  %v268_v50 = vpop.permute.xlu0 %267  ;;  %v2484_v43 = vrot.slane %v2390_v10, %v448_v32 }
  0x8e   :  { %v2447_v53 = vadd.f32 %v321_v47, %v169_v46  ;;  %v2449_v54 = vadd.f32 %v357_v48, %v205_v3  ;;  %v155_v56 = vsub.f32 %v110_v49, %v2399_v14  ;;  %v307_v57 = vsub.f32 %v268_v50, %v2396_v13 }
  0x90   :  { %v171_v59 = vmul.f32 %v155_v56, %v155_v56  ;;  %v207_v60 = vmul.f32 %v2407_v18, %v155_v56  ;;  %v323_v61 = vmul.f32 %v307_v57, %v307_v57  ;;  %v359_v62 = vmul.f32 %v2402_v15, %v307_v57 }
  0x91   :  { %v120_v63 = vpop.permute.xlu1 %119  ;;  %713 = vperm.xlu1 %1908, %v611_v52   ;;  %826 = vperm.xlu0 %1906, %v2379_v4   ;;  %v276_v0 = vpop.permute.xlu0 %275 }
  0x92   :  { %v2459_v6 = vadd.f32 %v323_v61, %v171_v59  ;;  %v2461_v7 = vadd.f32 %v359_v62, %v207_v60  ;;  %v157_v8 = vsub.f32 %v120_v63, %v2399_v14  ;;  %v309_v16 = vsub.f32 %v276_v0, %v2396_v13 }
  0x93   :  { %v148_v0 = vsub.f32 %v2385_v9, %v2399_v14 }
  0x94   :  { %v173_v19 = vmul.f32 %v157_v8, %v157_v8  ;;  %v209_v20 = vmul.f32 %v2407_v18, %v157_v8  ;;  %v325_v22 = vmul.f32 %v309_v16, %v309_v16  ;;  %v361_v4 = vmul.f32 %v2402_v15, %v309_v16 }
  0x95   :  { %v130_v23 = vpop.permute.xlu1 %129  ;;  %718 = vperm.xlu1 %1908, %v612_v5   ;;  %836 = vperm.xlu0 %1906, %v58_v33   ;;  %v284_v24 = vpop.permute.xlu0 %283  ;;  %v298_v8 = vsub.f32 %v2392_v11, %v2396_v13 }
  0x96   :  { %v2470_v26 = vadd.f32 %v325_v22, %v173_v19  ;;  %v2472_v27 = vadd.f32 %v361_v4, %v209_v20  ;;  %v159_v28 = vsub.f32 %v130_v23, %v2399_v14  ;;  %v311_v31 = vsub.f32 %v284_v24, %v2396_v13 }
  0x97   :  { %v164_v4 = vmul.f32 %v148_v0, %v148_v0  ;;  %v200_v24 = vmul.f32 %v2407_v18, %v148_v0 }
  0x98   :  { %v175_v34 = vmul.f32 %v159_v28, %v159_v28  ;;  %v211_v35 = vmul.f32 %v2407_v18, %v159_v28  ;;  %v327_v36 = vmul.f32 %v311_v31, %v311_v31  ;;  %v363_v37 = vmul.f32 %v2402_v15, %v311_v31 }
  0x99   :  { %v140_v38 = vpop.permute.xlu1 %139  ;;  %723 = vperm.xlu1 %1908, %v613_v25   ;;  %846 = vperm.xlu0 %1906, %v60_v58   ;;  %v2525_v25 = vmul.f32 %v298_v8, %v298_v8 }
  0x9a   :  { %v2479_v33 = vadd.f32 %v327_v36, %v175_v34  ;;  %v2481_v39 = vadd.f32 %v363_v37, %v211_v35  ;;  %v384_v40 = vpop.permute.xlu0 %383  ;;  %v161_v20 = vsub.f32 %v140_v38, %v2399_v14 }
  0x9b   :  { %v450_v22 = vsub.f32 %v384_v40, %v2484_v43 }
  0x9c   :  { %v2531_v34 = vmul.f32 %v161_v20, %v161_v20  ;;  %v2540_v38 = vmul.f32 %v2407_v18, %v161_v20 }
  0x9d   :  { %1909 = vset.pattern.permute.xlu1 %v2119_v2  ;;  %v2542_v40 = vmul.f32 %v450_v22, %v450_v22 }
  0x9e   :  { %811 = vperm.xlu1 %1909, %v2347_v51   ;;  %v236_v44 = vpop.permute.xlu1 %235  ;;  %v396_v46 = vpop.permute.xlu0 %395 }
  0x9f   :  { %v453_v3 = vsub.f32 %v396_v46, %v2484_v43  ;;  %v299_v28 = vsub.f32 %v236_v44, %v2396_v13 }
  0xa1   :  { %v469_v47 = vmul.f32 %v453_v3, %v453_v3 }
  0xa2   :  { %821 = vperm.xlu1 %1909, %v2357_v55   ;;  %v240_v48 = vpop.permute.xlu1 %239  ;;  %v404_v49 = vpop.permute.xlu0 %403  ;;  %v500_v55 = vsub.s32 5, %v2374_v1 }
  0xa3   :  { %v2491_v50 = vadd.f32 %v469_v47, %v2420_v29  ;;  %v455_v52 = vsub.f32 %v404_v49, %v2484_v43  ;;  %v300_v11 = vsub.f32 %v240_v48, %v2396_v13 }
  0xa4   :  { %v2505_v63 = vrot.slane %v2390_v10, %v500_v55 }
  0xa5   :  { %v537_v56 = vadd.f32 1e-12, %v2491_v50  ;;  %v471_v57 = vmul.f32 %v455_v52, %v455_v52  ;;  %v352_v47 = vmul.f32 %v2402_v15, %v300_v11 }
  0xa6   :  { %831 = vperm.xlu1 %1909, %v2414_v21   ;;  %v248_v2 = vpop.permute.xlu1 %247  ;;  %v412_v51 = vpop.permute.xlu0 %411  ;;  %v505_v9 = vmul.f32 %v2505_v63, %v453_v3  ;;  %v507_v44 = vmul.f32 %v2505_v63, %v455_v52  ;;  %v316_v3 = vmul.f32 %v300_v11, %v300_v11  ;;  %v2550_v49 = vmul.f32 %v2505_v63, %v450_v22 }
  0xa7   :  { %1935 = vrsqrt.f32 %v537_v56  ;;  %v2497_v58 = vadd.f32 %v471_v57, %v2432_v41  ;;  %v457_v59 = vsub.f32 %v412_v51, %v2484_v43  ;;  %v302_v48 = vsub.f32 %v248_v2, %v2396_v13 }
  0xa8   :  { %v521_v46 = vadd.f32 %v505_v9, %v2422_v30  ;;  %v2552_v56 = vmul.f32 %v299_v28, %v299_v28  ;;  %v523_v0 = vadd.f32 %v507_v44, %v2434_v42 }
  0xa9   :  { %v539_v29 = vadd.f32 1e-12, %v2497_v58  ;;  %v473_v60 = vmul.f32 %v457_v59, %v457_v59  ;;  %v509_v57 = vmul.f32 %v2505_v63, %v457_v59 }
  0xaa   :  { %841 = vperm.xlu1 %1909, %v2441_v45   ;;  %v256_v61 = vpop.permute.xlu1 %255  ;;  %v420_v62 = vpop.permute.xlu0 %419 }
  0xab   :  { %1937 = vrsqrt.f32 %v539_v29  ;;  %v459_v21 = vsub.f32 %v420_v62, %v2484_v43  ;;  %v2508_v41 = vadd.f32 %v473_v60, %v2447_v53  ;;  %v304_v52 = vsub.f32 %v256_v61, %v2396_v13 }
  0xac   :  { %v2561_v62 = vmul.f32 %v2402_v15, %v299_v28  ;;  %v2570_v61 = vmul.f32 %v302_v48, %v302_v48  ;;  %v525_v20 = vadd.f32 %v509_v57, %v2449_v54 }
  0xad   :  { %v475_v5 = vmul.f32 %v459_v21, %v459_v21  ;;  %v541_v45 = vadd.f32 1e-12, %v2508_v41  ;;  %v511_v29 = vmul.f32 %v2505_v63, %v459_v21  ;;  %v2579_v9 = vmul.f32 %v304_v52, %v304_v52 }
  0xae   :  { %851 = vperm.xlu1 %1909, %v61_v17   ;;  %v264_v16 = vpop.permute.xlu1 %263  ;;  %v428_v19 = vpop.permute.xlu0 %427 }
  0xaf   :  { %v2517_v10 = vadd.f32 %v475_v5, %v2459_v6  ;;  %v461_v53 = vsub.f32 %v428_v19, %v2484_v43  ;;  %1939 = vrsqrt.f32 %v541_v45  ;;  %v2528_v6 = vmul.f32 %v2402_v15, %v298_v8 }
  0xb0   :  { %v306_v5 = vsub.f32 %v264_v16, %v2396_v13  ;;  %v2566_v8 = vadd.f32 %v316_v3, %v164_v4  ;;  %v2568_v45 = vadd.f32 %v352_v47, %v200_v24  ;;  %v2574_v19 = vmul.f32 %v2402_v15, %v302_v48 }
  0xb1   :  { %v543_v23 = vadd.f32 1e-12, %v2517_v10  ;;  %v477_v17 = vmul.f32 %v461_v53, %v461_v53  ;;  %v513_v59 = vmul.f32 %v2505_v63, %v461_v53  ;;  %v2582_v53 = vmul.f32 %v2402_v15, %v304_v52 }
  0xb2   :  { %v272_v31 = vpop.permute.xlu1 %271  ;;  %v436_v32 = vpop.permute.xlu0 %435  ;;  %v527_v4 = vadd.f32 %v511_v29, %v2461_v7  ;;  %v2591_v54 = vmul.f32 %v2402_v15, %v306_v5 }
  0xb3   :  { %1941 = vrsqrt.f32 %v543_v23  ;;  %v2534_v35 = vadd.f32 %v477_v17, %v2470_v26  ;;  %v463_v36 = vsub.f32 %v436_v32, %v2484_v43  ;;  %v308_v21 = vsub.f32 %v272_v31, %v2396_v13 }
  0xb4   :  { %v2537_v37 = vpop.eup %1935  ;;  %v2588_v17 = vmul.f32 %v306_v5, %v306_v5  ;;  %v529_v24 = vadd.f32 %v513_v59, %v2472_v27 }
  0xb5   :  { %v545_v26 = vadd.f32 1e-12, %v2534_v35  ;;  %v585_v30 = vmul.f32 %v2537_v37, %v521_v46  ;;  %v479_v60 = vmul.f32 %v463_v36, %v463_v36  ;;  %v515_v22 = vmul.f32 %v2505_v63, %v463_v36 }
  0xb6   :  { %v280_v51 = vpop.permute.xlu1 %279  ;;  %v440_v55 = vpop.permute.xlu0 %439  ;;  %v2599_v32 = vmul.f32 %v2537_v37, %v2491_v50  ;;  %v2601_v7 = vmul.f32 %v308_v21, %v308_v21  ;;  %v2606_v46 = vmul.f32 %v2402_v15, %v308_v21 }
  0xb7   :  { %1943 = vrsqrt.f32 %v545_v26  ;;  %v2586_v11 = vadd.f32 %v479_v60, %v2479_v33  ;;  %v310_v33 = vsub.f32 %v280_v51, %v2396_v13  ;;  %v464_v36 = vsub.f32 %v440_v55, %v2484_v43 }
  0xb8   :  { %v2558_v2 = vpop.eup %1937  ;;  %3145 = vst [vmem:[#allocation8_spill] sm:$0xff] %v2599_v32  ;;  %v2609_v44 = vadd.f32 %v515_v22, %v2481_v39  ;;  %v617_v3 = vsub.f32 1.0, %v585_v30 }
  0xb9   :  { %3143 = vst [vmem:[#allocation6_spill] sm:$0xff] %v2558_v2  ;;  %v587_v16 = vmul.f32 %v2558_v2, %v523_v0  ;;  %v547_v47 = vadd.f32 1e-12, %v2586_v11  ;;  %v2619_v55 = vmul.f32 %v2558_v2, %v2497_v58  ;;  %v2624_v60 = vmul.f32 %v310_v33, %v310_v33 }
  0xba   :  { %v288_v42 = vpop.permute.xlu1 %287  ;;  %3146 = vst [vmem:[#allocation9_spill] sm:$0xff] %v2609_v44  ;;  %v2627_v0 = vmul.f32 %v2402_v15, %v310_v33  ;;  %v2629_v5 = vmul.f32 %v464_v36, %v464_v36  ;;  %v2633_v21 = vmul.f32 %v2505_v63, %v464_v36 }
  0xbb   :  { %v65_v23 = vpop.permute.xlu0 %64  ;;  %v312_v48 = vsub.f32 %v288_v42, %v2396_v13  ;;  %3148 = vst [vmem:[#allocation11_spill] sm:$0xff] %v2619_v55  ;;  %1945 = vrsqrt.f32 %v547_v47 }
  0xbc   :  { %v146_v28 = vsub.f32 %v65_v23, %v2399_v14  ;;  %v2595_v31 = vpop.eup %1939  ;;  %3149 = vst [vmem:[#allocation12_spill] sm:$0xff] %v2633_v21 }
  0xbd   :  { %3144 = vst [vmem:[#allocation7_spill] sm:$0xff] %v2595_v31  ;;  %v589_v51 = vmul.f32 %v2595_v31, %v525_v20  ;;  %v2635_v20 = vmul.f32 %v617_v3, %v617_v3  ;;  %v2637_v22 = vmul.f32 %v312_v48, %v312_v48 }
  0xbe   :  { %v162_v27 = vmul.f32 %v146_v28, %v146_v28  ;;  %v198_v50 = vmul.f32 %v2407_v18, %v146_v28 }
  0xbf   :  { %v388_v26 = vpop.permute.xlu1 %387  ;;  %v70_v57 = vpop.permute.xlu0 %69 }
  0xc0   :  { %v2615_v52 = vpop.eup %1941  ;;  %v330_v39 = vadd.f32 %v2525_v25, %v162_v27  ;;  %v451_v30 = vsub.f32 %v388_v26, %v2484_v43  ;;  %v147_v29 = vsub.f32 %v70_v57, %v2399_v14  ;;  %v619_v25 = vsub.f32 1.0, %v587_v16 }
  0xc1   :  { %3147 = vst [vmem:[#allocation10_spill] sm:$0xff] %v2615_v52  ;;  %v591_v59 = vmul.f32 %v2615_v52, %v527_v4  ;;  %v366_v42 = vadd.f32 %v2528_v6, %v198_v50  ;;  %v2650_v16 = vmul.f32 %v2595_v31, %v2508_v41  ;;  %v2653_v6 = vmul.f32 %v2402_v15, %v312_v48 }
  0xc2   :  { %v163_v58 = vmul.f32 %v147_v29, %v147_v29  ;;  %v2641_v23 = vadd.f32 %v2542_v40, %v330_v39  ;;  %v467_v4 = vmul.f32 %v451_v30, %v451_v30  ;;  %v621_v40 = vsub.f32 1.0, %v589_v51 }
  0xc3   :  { %v392_v28 = vpop.permute.xlu1 %391  ;;  %v85_v33 = vpop.permute.xlu0 %84  ;;  %3151 = vst [vmem:[#allocation14_spill] sm:$0xff] %v2650_v16  ;;  %v199_v50 = vmul.f32 %v2407_v18, %v147_v29  ;;  %v2661_v39 = vmul.f32 %v619_v25, %v619_v25  ;;  %v623_v51 = vsub.f32 1.0, %v591_v59 }
  0xc4   :  { %v2643_v27 = vpop.eup %1943  ;;  %v331_v36 = vadd.f32 %v2552_v56, %v163_v58  ;;  %v452_v26 = vsub.f32 %v392_v28, %v2484_v43  ;;  %v150_v3 = vsub.f32 %v85_v33, %v2399_v14  ;;  %v2665_v58 = vmul.f32 %v2615_v52, %v2517_v10 }
  0xc5   :  { %3150 = vst [vmem:[#allocation13_spill] sm:$0xff] %v2643_v27  ;;  %v2656_v47 = vmul.f32 %v2643_v27, %v529_v24  ;;  %v534_v41 = vadd.f32 1e-12, %v2641_v23  ;;  %v503_v24 = vmul.f32 %v2505_v63, %v451_v30  ;;  %v2680_v52 = vmul.f32 %v621_v40, %v621_v40 }
  0xc6   :  { %v2659_v57 = vadd.f32 %v467_v4, %v331_v36  ;;  %v468_v56 = vmul.f32 %v452_v26, %v452_v26  ;;  %3153 = vst [vmem:[#allocation16_spill] sm:$0xff] %v2665_v58  ;;  %v166_v28 = vmul.f32 %v150_v3, %v150_v3  ;;  %v2676_v4 = vadd.f32 %v2550_v49, %v366_v42 }
  0xc7   :  { %3152 = vst [vmem:[#allocation15_spill] sm:$0xff] %v2656_v47  ;;  %v400_v48 = vpop.permute.xlu1 %399  ;;  %v95_v33 = vpop.permute.xlu0 %94  ;;  %v367_v30 = vadd.f32 %v2561_v62, %v199_v50  ;;  %v2689_v49 = vmul.f32 %v2643_v27, %v2534_v35  ;;  %1947 = vrsqrt.f32 %v534_v41  ;;  %v2691_v40 = vmul.f32 %v623_v51, %v623_v51 }
  0xc8   :  { %v2670_v12 = vadd.f32 %v468_v56, %v2566_v8  ;;  %v2673_v29 = vsub.f32 %v400_v48, %v2484_v43  ;;  %v1844_v25 = vpop.f32.mrf.mxu0  ;;  %v535_v10 = vadd.f32 1e-12, %v2659_v57  ;;  %v152_v36 = vsub.f32 %v95_v33, %v2399_v14  ;;  %v1868_v58 = vpop.f32.mrf.mxu1 }
  0xc9   :  { %v1360_v1 = vmul.f32 0.5, %v1844_v25  ;;  %v334_v59 = vadd.f32 %v2570_v61, %v166_v28  ;;  %3154 = vst [vmem:[#allocation17_spill] sm:$0xff] %v2689_v49  ;;  %v504_v31 = vmul.f32 %v2505_v63, %v452_v26  ;;  %v202_v35 = vmul.f32 %v2407_v18, %v150_v3  ;;  %v2703_v26 = vpop.eup %1945 }
  0xca   :  { %v536_v8 = vadd.f32 1e-12, %v2670_v12  ;;  %v470_v56 = vmul.f32 %v2673_v29, %v2673_v29  ;;  %v1167_v48 = vpop.f32.mrf.mxu0  ;;  %v168_v42 = vmul.f32 %v152_v36, %v152_v36  ;;  %v1263_v28 = vpop.f32.mrf.mxu1  ;;  %3155 = vst [vmem:[#allocation18_spill] sm:$0xff] %v2703_v26 }
  0xcb   :  { %v408_v33 = vpop.permute.xlu1 %407  ;;  %v105_v25 = vpop.permute.xlu0 %104  ;;  %1949 = vtanh.f32 %v1360_v1  ;;  %v1358_v62 = vmul.f32 0.5, %v1167_v48  ;;  %v1382_v55 = vmul.f32 0.5, %v1263_v28 }
  0xcc   :  { %v2693_v16 = vadd.f32 %v470_v56, %v334_v59  ;;  %v456_v61 = vsub.f32 %v408_v33, %v2484_v43  ;;  %v1845_v50 = vpop.f32.mrf.mxu0  ;;  %1951 = vrsqrt.f32 %v535_v10  ;;  %v154_v41 = vsub.f32 %v105_v25, %v2399_v14  ;;  %v1869_v59 = vpop.f32.mrf.mxu1 }
  0xcd   :  { %1953 = vrsqrt.f32 %v536_v8  ;;  %v336_v49 = vadd.f32 %v2579_v9, %v168_v42  ;;  %v2700_v56 = vadd.f32 %v503_v24, %v367_v30  ;;  %v1361_v33 = vmul.f32 0.5, %v1845_v50 }
  0xce   :  { %v472_v51 = vmul.f32 %v456_v61, %v456_v61  ;;  %v1170_v27 = vpop.f32.mrf.mxu0  ;;  %v538_v1 = vadd.f32 1e-12, %v2693_v16  ;;  %v170_v48 = vmul.f32 %v154_v41, %v154_v41  ;;  %1955 = vtanh.f32 %v1358_v62 }
  0xcf   :  { %v1359_v21 = vmul.f32 0.5, %v1170_v27  ;;  %v416_v10 = vpop.permute.xlu1 %415  ;;  %v115_v44 = vpop.permute.xlu0 %114  ;;  %v1384_v8 = vmul.f32 0.5, %v1868_v58  ;;  %v2709_v42 = vadd.f32 %v504_v31, %v2568_v45  ;;  %v204_v24 = vmul.f32 %v2407_v18, %v152_v36 }
  0xd0   :  { %v2705_v3 = vadd.f32 %v472_v51, %v336_v49  ;;  %v1848_v25 = vpop.f32.mrf.mxu0  ;;  %1957 = vtanh.f32 %v1361_v33  ;;  %v458_v30 = vsub.f32 %v416_v10, %v2484_v43  ;;  %v156_v50 = vsub.f32 %v115_v44, %v2399_v14  ;;  %v1266_v51 = vpop.f32.mrf.mxu1 }
  0xd1   :  { %1959 = vtanh.f32 %v1359_v21  ;;  %v1364_v62 = vmul.f32 0.5, %v1848_v25  ;;  %v338_v58 = vadd.f32 %v2588_v17, %v170_v48  ;;  %v2718_v36 = vmul.f32 %v2703_v26, %v2586_v11 }
  0xd2   :  { %v540_v27 = vadd.f32 1e-12, %v2705_v3  ;;  %v1183_v49 = vpop.f32.mrf.mxu0  ;;  %1961 = vrsqrt.f32 %v538_v1  ;;  %v474_v9 = vmul.f32 %v458_v30, %v458_v30  ;;  %v370_v33 = vadd.f32 %v2574_v19, %v202_v35 }
  0xd3   :  { %v424_v45 = vpop.permute.xlu1 %423  ;;  %v125_v31 = vpop.permute.xlu0 %124  ;;  %3156 = vst [vmem:[#allocation19_spill] sm:$0xff] %v2718_v36  ;;  %v506_v21 = vmul.f32 %v2505_v63, %v2673_v29  ;;  %1963 = vtanh.f32 %v1384_v8  ;;  %v172_v1 = vmul.f32 %v156_v50, %v156_v50  ;;  %v1362_v17 = vmul.f32 0.5, %v1183_v49 }
  0xd4   :  { %v1849_v44 = vpop.f32.mrf.mxu0  ;;  %v2723_v10 = vadd.f32 %v474_v9, %v338_v58  ;;  %1965 = vtanh.f32 %v1364_v62  ;;  %v372_v28 = vadd.f32 %v2582_v53, %v204_v24  ;;  %v206_v48 = vmul.f32 %v2407_v18, %v154_v41  ;;  %v1872_v36 = vpop.f32.mrf.mxu1 }
  0xd5   :  { %1967 = vrsqrt.f32 %v540_v27  ;;  %v1385_v25 = vmul.f32 0.5, %v1869_v59  ;;  %v508_v19 = vmul.f32 %v2505_v63, %v456_v61  ;;  %v460_v29 = vsub.f32 %v424_v45, %v2484_v43  ;;  %v2730_v58 = vpop.eup %1947 }
  0xd6   :  { %v1186_v11 = vpop.f32.mrf.mxu0  ;;  %1969 = vtanh.f32 %v1382_v55  ;;  %v158_v35 = vsub.f32 %v125_v31, %v2399_v14  ;;  %v510_v62 = vmul.f32 %v2505_v63, %v458_v30  ;;  %v1365_v53 = vmul.f32 0.5, %v1849_v44 }
  0xd7   :  { %v432_v8 = vpop.permute.xlu1 %431  ;;  %v135_v9 = vpop.permute.xlu0 %134  ;;  %1971 = vtanh.f32 %v1362_v17  ;;  %v1383_v24 = vmul.f32 0.5, %v1266_v51  ;;  %v542_v27 = vadd.f32 1e-12, %v2723_v10  ;;  %v340_v61 = vadd.f32 %v2601_v7, %v172_v1 }
  0xd8   :  { %v1852_v41 = vpop.f32.mrf.mxu0  ;;  %v1950_v59 = vpop.eup %1949  ;;  %1973 = vtanh.f32 %v1385_v25  ;;  %v476_v55 = vmul.f32 %v460_v29, %v460_v29  ;;  %v2737_v45 = vadd.f32 %v506_v21, %v370_v33  ;;  %v374_v31 = vadd.f32 %v2591_v54, %v206_v48 }
  0xd9   :  { %v2735_v49 = vpop.eup %1951  ;;  %v208_v26 = vmul.f32 %v2407_v18, %v156_v50  ;;  %1975 = vtanh.f32 %v1365_v53  ;;  %v2745_v44 = vadd.f32 %v508_v19, %v372_v28  ;;  %v174_v7 = vmul.f32 %v158_v35, %v158_v35  ;;  %v1279_v1 = vpop.f32.mrf.mxu1 }
  0xda   :  { %v2741_v30 = vpop.f32.mrf.mxu0  ;;  %v2743_v51 = vpop.eup %1953  ;;  %v2747_v17 = vadd.f32 %v476_v55, %v340_v61  ;;  %1977 = vtanh.f32 %v1383_v24  ;;  %v2751_v33 = vmul.f32 %v2730_v58, %v2641_v23  ;;  %v1456_v21 = vmul.f32 0.5, %v1950_v59 }
  0xdb   :  { %v2753_v54 = vadd.f32 %v510_v62, %v374_v31  ;;  %v512_v50 = vmul.f32 %v2505_v63, %v460_v29  ;;  %v1956_v28 = vpop.eup %1955  ;;  %1979 = vrsqrt.f32 %v542_v27  ;;  %v1363_v19 = vmul.f32 0.5, %v1186_v11  ;;  %v2762_v61 = vpop.permute.xlu0 %648 }
  0xdc   :  { %3157 = vst [vmem:[#allocation20_spill] sm:$0xff] %v2751_v33  ;;  %v2756_v48 = vpop.f32.mrf.mxu0  ;;  %v2758_v25 = vpop.permute.xlu1 %291  ;;  %v462_v53 = vsub.f32 %v432_v8, %v2484_v43  ;;  %v160_v24 = vsub.f32 %v135_v9, %v2399_v14  ;;  %v2766_v62 = vmul.f32 %v2735_v49, %v2659_v57  ;;  %v2770_v29 = vmul.f32 %v2743_v51, %v2670_v12 }
  0xdd   :  { %v1958_v23 = vpop.eup %1957  ;;  %v376_v59 = vadd.f32 %v2606_v46, %v208_v26  ;;  %v544_v27 = vadd.f32 1e-12, %v2747_v17  ;;  %v210_v14 = vmul.f32 %v2407_v18, %v158_v35  ;;  %v342_v9 = vadd.f32 %v2624_v60, %v174_v7  ;;  %v1873_v46 = vpop.f32.mrf.mxu1 }
  0xde   :  { %3158 = vst [vmem:[#allocation21_spill] sm:$0xff] %v2766_v62  ;;  %3159 = vst [vmem:[#allocation22_spill] sm:$0xff] %v2770_v29  ;;  %v2774_v11 = vpop.f32.mrf.mxu0  ;;  %v1960_v8 = vpop.eup %1959  ;;  %v1388_v55 = vmul.f32 0.5, %v1872_v36  ;;  %v478_v31 = vmul.f32 %v462_v53, %v462_v53  ;;  %v2780_v57 = vadd.f32 0.5, %v1456_v21  ;;  %v176_v12 = vmul.f32 %v160_v24, %v160_v24 }
  0xdf   :  { %v2778_v47 = vpop.eup %1961  ;;  %v2782_v62 = vadd.f32 %v512_v50, %v376_v59  ;;  %v1368_v29 = vmul.f32 0.5, %v1852_v41  ;;  %v1454_v32 = vmul.f32 0.5, %v1956_v28  ;;  %v1457_v33 = vmul.f32 0.5, %v1958_v23  ;;  %v664_v23 = vpop.permute.xlu0 %663 }
  0xe0   :  { %3160 = vst [vmem:[#allocation23_spill] sm:$0xff] %v2780_v57  ;;  %v2784_v26 = vpop.f32.mrf.mxu0  ;;  %v1964_v2 = vpop.eup %1963  ;;  %1981 = vtanh.f32 %v1363_v19  ;;  %v2786_v35 = vadd.f32 %v478_v31, %v342_v9  ;;  %v1455_v7 = vmul.f32 0.5, %v1960_v8  ;;  %v514_v21 = vmul.f32 %v2505_v63, %v462_v53 }
  0xe1   :  { %v2788_v60 = vpop.permute.xlu1 %443  ;;  %v1966_v36 = vpop.eup %1965  ;;  %1983 = vrsqrt.f32 %v544_v27  ;;  %v344_v50 = vadd.f32 %v2637_v22, %v176_v12  ;;  %v378_v57 = vadd.f32 %v2627_v0, %v210_v14  ;;  %v212_v19 = vmul.f32 %v2407_v18, %v160_v24 }
  0xe2   :  { %v2792_v59 = vpop.f32.mrf.mxu0  ;;  %v2794_v41 = vpop.eup %1967  ;;  %1985 = vtanh.f32 %v1388_v55  ;;  %v546_v28 = vadd.f32 1e-12, %v2786_v35  ;;  %v1480_v31 = vmul.f32 0.5, %v1964_v2  ;;  %v1386_v53 = vmul.f32 0.5, %v1279_v1 }
  0xe3   :  { %v1970_v9 = vpop.eup %1969  ;;  %v2800_v27 = vadd.f32 %v2629_v5, %v344_v50  ;;  %1987 = vtanh.f32 %v1368_v29  ;;  %v1282_v22 = vpop.f32.mrf.mxu1  ;;  %v2804_v12 = vmul.f32 %v2778_v47, %v2693_v16  ;;  %v2806_v0 = vadd.f32 0.5, %v1454_v32 }
  0xe4   :  { %v1972_v8 = vpop.eup %1971  ;;  %v1460_v14 = vmul.f32 0.5, %v1966_v36  ;;  %v1366_v55 = vmul.f32 0.5, %v2741_v30  ;;  %v2809_v18 = vpop.f32.mrf.mxu0  ;;  %v2813_v2 = vmul.f32 %v2794_v41, %v2705_v3  ;;  %v2815_v5 = vadd.f32 0.5, %v1457_v33 }
  0xe5   :  { %3161 = vst [vmem:[#allocation24_spill] sm:$0xff] %v2804_v12  ;;  %v1974_v24 = vpop.eup %1973  ;;  %v2817_v1 = vadd.f32 0.5, %v1455_v7  ;;  %v2819_v29 = vadd.f32 %v514_v21, %v378_v57  ;;  %1989 = vrsqrt.f32 %v546_v28  ;;  %v2824_v36 = vadd.f32 %v2653_v6, %v212_v19  ;;  %v1876_v57 = vpop.f32.mrf.mxu1 }
  0xe6   :  { %3162 = vst [vmem:[#allocation25_spill] sm:$0xff] %v2813_v2  ;;  %v2821_v16 = vpop.permute.xlu1 %653  ;;  %v1976_v32 = vpop.eup %1975  ;;  %v1389_v30 = vmul.f32 0.5, %v1873_v46  ;;  %v582_v50 = vmul.f32 %v2730_v58, %v2676_v4  ;;  %v2828_v3 = vadd.f32 0.5, %v1480_v31  ;;  %v1478_v33 = vmul.f32 0.5, %v1970_v9 }
  0xe7   :  { %3163 = vst [vmem:[#allocation26_spill] sm:$0xff] %v2819_v29  ;;  %3164 = vst [vmem:[#allocation27_spill] sm:$0xff] %v2824_v36  ;;  %v1978_v12 = vpop.eup %1977  ;;  %v548_v7 = vadd.f32 1e-12, %v2800_v27  ;;  %1991 = vtanh.f32 %v1386_v53  ;;  %v2831_v21 = vadd.f32 0.5, %v1460_v14  ;;  %v1458_v2 = vmul.f32 0.5, %v1972_v8  ;;  %v674_v29 = vpop.permute.xlu0 %673 }
  0xe8   :  { %3165 = vst [vmem:[#allocation28_spill] sm:$0xff] %v2828_v3  ;;  %1993 = vtanh.f32 %v1366_v55  ;;  %v614_v28 = vsub.f32 1.0, %v582_v50  ;;  %v2833_v6 = vpop.f32.mrf.mxu0  ;;  %v2835_v46 = vpop.eup %1979  ;;  %v1481_v19 = vmul.f32 0.5, %v1974_v24  ;;  %v1461_v4 = vmul.f32 0.5, %v1976_v32 }
  0xe9   :  { %v1479_v36 = vmul.f32 0.5, %v1978_v12  ;;  %v1369_v31 = vmul.f32 0.5, %v2756_v48  ;;  %1995 = vtanh.f32 %v1389_v30  ;;  %v313_v14 = vsub.f32 %v2758_v25, %v2396_v13  ;;  %v1295_v30 = vpop.f32.mrf.mxu1 }
  0xea   :  { %v2838_v9 = vpop.permute.xlu1 %658  ;;  %v630_v53 = vmul.f32 %v614_v28, %v614_v28  ;;  %v1387_v8 = vmul.f32 0.5, %v1282_v22  ;;  %v2842_v55 = vadd.f32 0.5, %v1478_v33  ;;  %1997 = vrsqrt.f32 %v548_v7  ;;  %v1860_v28 = vpop.f32.mrf.mxu0 }
  0xeb   :  { %v1367_v50 = vmul.f32 0.5, %v2774_v11  ;;  %v729_v3 = vmul.f32 %v664_v23, %v2635_v20  ;;  %v2848_v12 = vmul.f32 %v2835_v46, %v2723_v10  ;;  %v2850_v48 = vadd.f32 0.5, %v1458_v2  ;;  %v1877_v2 = vpop.f32.mrf.mxu1  ;;  %v684_v7 = vpop.permute.xlu0 %683 }
  0xec   :  { %v726_v24 = vmul.f32 %v2762_v61, %v630_v53  ;;  %v1392_v32 = vmul.f32 0.5, %v1876_v57  ;;  %v2853_v25 = vadd.f32 0.5, %v1481_v19  ;;  %v2855_v22 = vadd.f32 0.5, %v1461_v4 }
  0xed   :  { %3166 = vst [vmem:[#allocation29_spill] sm:$0xff] %v2848_v12  ;;  %v1982_v13 = vpop.eup %1981  ;;  %1999 = vtanh.f32 %v1369_v31  ;;  %v748_v11 = vmul.f32 1.442695, %v729_v3  ;;  %v2859_v20 = vadd.f32 0.5, %v1479_v36  ;;  %v329_v23 = vmul.f32 %v313_v14, %v313_v14 }
  0xee   :  { %3167 = vst [vmem:[#allocation30_spill] sm:$0xff] %v2853_v25  ;;  %3168 = vst [vmem:[#allocation31_spill] sm:$0xff] %v2855_v22  ;;  %v2857_v33 = vpop.eup %1983  ;;  %v742_v10 = vmul.f32 1.442695, %v726_v24  ;;  %2001 = vtanh.f32 %v1387_v8  ;;  %v365_v57 = vmul.f32 %v2402_v15, %v313_v14  ;;  %v1372_v19 = vmul.f32 0.5, %v2784_v26  ;;  %v2865_v31 = vpop.permute.xlu1 %668 }
  0xef   :  { %3169 = vst [vmem:[#allocation32_spill] sm:$0xff] %v2857_v33  ;;  %3170 = vst [vmem:[#allocation33_spill] sm:$0xff] %v2859_v20  ;;  %v1986_v61 = vpop.eup %1985  ;;  %2003 = vtanh.f32 %v1367_v50  ;;  %v465_v4 = vsub.f32 %v2788_v60, %v2484_v43  ;;  %v1459_v53 = vmul.f32 0.5, %v1982_v13  ;;  %v1390_v36 = vmul.f32 0.5, %v1295_v30  ;;  %v1231_v8 = vpop.f32.mrf.mxu0 }
  0xf0   :  { %v1988_v3 = vpop.eup %1987  ;;  %2005 = vtanh.f32 %v1392_v32  ;;  %v731_v24 = vmul.f32 %v674_v29, %v2661_v39  ;;  %v2870_v25 = vmul.f32 %v2857_v33, %v2747_v17  ;;  %v1370_v26 = vmul.f32 0.5, %v2792_v59  ;;  %v1298_v50 = vpop.f32.mrf.mxu1 }
  0xf1   :  { %2007 = vpow2.f32 %v748_v11  ;;  %v481_v15 = vmul.f32 %v465_v4, %v465_v4  ;;  %v1484_v14 = vmul.f32 0.5, %v1986_v61  ;;  %v345_v43 = vadd.f32 %v329_v23, %v2531_v34  ;;  %v1861_v34 = vpop.f32.mrf.mxu0 }
  0xf2   :  { %3171 = vst [vmem:[#allocation34_spill] sm:$0xff] %v2870_v25  ;;  %2009 = vpow2.f32 %v742_v10  ;;  %v752_v60 = vmul.f32 1.442695, %v731_v24  ;;  %v2874_v13 = vpop.eup %1989  ;;  %v1464_v32 = vmul.f32 0.5, %v1988_v3  ;;  %v381_v39 = vadd.f32 %v365_v57, %v2540_v38  ;;  %v2881_v10 = vpop.permute.xlu0 %693 }
  0xf3   :  { %2011 = vtanh.f32 %v1372_v19  ;;  %v1373_v29 = vmul.f32 0.5, %v2809_v18  ;;  %v517_v30 = vmul.f32 %v2505_v63, %v465_v4  ;;  %v583_v59 = vmul.f32 %v2735_v49, %v2700_v56  ;;  %v2888_v18 = vpop.permute.xlu1 %678 }
  0xf4   :  { %v1992_v17 = vpop.eup %1991  ;;  %2013 = vtanh.f32 %v1390_v36  ;;  %v1393_v11 = vmul.f32 0.5, %v1877_v2  ;;  %v2883_v61 = vadd.f32 0.5, %v1459_v53  ;;  %v2885_v3 = vadd.f32 %v481_v15, %v345_v43  ;;  %v1880_v2 = vpop.f32.mrf.mxu1 }
  0xf5   :  { %v1994_v23 = vpop.eup %1993  ;;  %2015 = vtanh.f32 %v1370_v26  ;;  %v1371_v38 = vmul.f32 0.5, %v2833_v6  ;;  %v2890_v57 = vadd.f32 0.5, %v1484_v14  ;;  %v2894_v63 = vmul.f32 %v2874_v13, %v2786_v35  ;;  %v1234_v14 = vpop.f32.mrf.mxu0 }
  0xf6   :  { %2017 = vpow2.f32 %v752_v60  ;;  %v615_v56 = vsub.f32 1.0, %v583_v59  ;;  %v1996_v19 = vpop.eup %1995  ;;  %v2896_v4 = vadd.f32 0.5, %v1464_v32  ;;  %v1482_v53 = vmul.f32 0.5, %v1992_v17 }
  0xf7   :  { %3172 = vst [vmem:[#allocation35_spill] sm:$0xff] %v2890_v57  ;;  %3173 = vst [vmem:[#allocation36_spill] sm:$0xff] %v2894_v63  ;;  %2019 = vtanh.f32 %v1373_v29  ;;  %v1376_v36 = vmul.f32 0.5, %v1860_v28  ;;  %v2898_v24 = vpop.eup %1997  ;;  %v1462_v6 = vmul.f32 0.5, %v1994_v23  ;;  %v2900_v15 = vadd.f32 %v517_v30, %v381_v39  ;;  %v1311_v29 = vpop.f32.mrf.mxu1 }
  0xf8   :  { %3174 = vst [vmem:[#allocation37_spill] sm:$0xff] %v2896_v4  ;;  %2021 = vtanh.f32 %v1393_v11  ;;  %v1391_v26 = vmul.f32 0.5, %v1298_v50  ;;  %v549_v35 = vadd.f32 1e-12, %v2885_v3  ;;  %v631_v43 = vmul.f32 %v615_v56, %v615_v56  ;;  %v777_v23 = vpop.permute.xlu0 %776  ;;  %v1864_v56 = vpop.f32.mrf.mxu0 }
  0xf9   :  { %2023 = vtanh.f32 %v1371_v38  ;;  %v733_v60 = vmul.f32 %v684_v7, %v2680_v52  ;;  %v1485_v32 = vmul.f32 0.5, %v1996_v19  ;;  %v1374_v17 = vmul.f32 0.5, %v1231_v8  ;;  %v2911_v38 = vpop.permute.xlu1 %688 }
  0xfa   :  { %v2000_v59 = vpop.eup %1999  ;;  %2025 = vtanh.f32 %v1376_v36  ;;  %v584_v28 = vmul.f32 %v2743_v51, %v2709_v42  ;;  %v2908_v50 = vmul.f32 %v2898_v24, %v2800_v27  ;;  %v727_v30 = vmul.f32 %v2821_v16, %v631_v43  ;;  %v1881_v43 = vpop.f32.mrf.mxu1 }
  0xfb   :  { %v2002_v39 = vpop.eup %2001  ;;  %2027 = vtanh.f32 %v1391_v26  ;;  %v1396_v11 = vmul.f32 0.5, %v1880_v2  ;;  %v2913_v7 = vadd.f32 0.5, %v1482_v53  ;;  %v2915_v8 = vadd.f32 0.5, %v1462_v6 }
  0xfc   :  { %3175 = vst [vmem:[#allocation38_spill] sm:$0xff] %v2908_v50  ;;  %v2004_v52 = vpop.eup %2003  ;;  %2029 = vtanh.f32 %v1374_v17  ;;  %v616_v42 = vsub.f32 1.0, %v584_v28  ;;  %v1465_v36 = vmul.f32 0.5, %v2000_v59  ;;  %v756_v57 = vmul.f32 1.442695, %v733_v60  ;;  %v1247_v59 = vpop.f32.mrf.mxu0 }
  0xfd   :  { %3176 = vst [vmem:[#allocation39_spill] sm:$0xff] %v2913_v7  ;;  %v2006_v19 = vpop.eup %2005  ;;  %2031 = vtanh.f32 %v1396_v11  ;;  %v1377_v27 = vmul.f32 0.5, %v1861_v34  ;;  %v2919_v16 = vadd.f32 0.5, %v1485_v32  ;;  %v1394_v26 = vmul.f32 0.5, %v1311_v29 }
  0xfe   :  { %v2917_v50 = vpop.eup %2007  ;;  %2033 = vrsqrt.f32 %v549_v35  ;;  %v632_v2 = vmul.f32 %v616_v42, %v616_v42  ;;  %v1483_v63 = vmul.f32 0.5, %v2002_v39  ;;  %v744_v6 = vmul.f32 1.442695, %v727_v30  ;;  %v2926_v35 = vpop.permute.xlu0 %786 }
  0xff   :  { %3177 = vst [vmem:[#allocation40_spill] sm:$0xff] %v2919_v16  ;;  %v2010_v53 = vpop.eup %2009  ;;  %2035 = vtanh.f32 %v1377_v27  ;;  %v1375_v17 = vmul.f32 0.5, %v1234_v14  ;;  %v735_v60 = vmul.f32 %v2881_v10, %v2691_v40  ;;  %v586_v34 = vmul.f32 %v2778_v47, %v2737_v45  ;;  %v2930_v14 = vpop.permute.xlu1 %698 }
 0x100   :  { %v2012_v28 = vpop.eup %2011  ;;  %v728_v7 = vmul.f32 %v2838_v9, %v632_v2  ;;  %2037 = vtanh.f32 %v1394_v26  ;;  %v2928_v29 = vadd.f32 0.5, %v1465_v36  ;;  %v1463_v39 = vmul.f32 0.5, %v2004_v52  ;;  %v1314_v10 = vpop.f32.mrf.mxu1 }
 0x101   :  { %v2014_v32 = vpop.eup %2013  ;;  %2039 = vpow2.f32 %v756_v57  ;;  %v1397_v30 = vmul.f32 0.5, %v1881_v43  ;;  %v1488_v9 = vmul.f32 0.5, %v2006_v19  ;;  %v618_v40 = vsub.f32 1.0, %v586_v34  ;;  %v1865_v43 = vpop.f32.mrf.mxu0 }
 0x102   :  { %3178 = vst [vmem:[#allocation41_spill] sm:$0xff] %v2928_v29  ;;  %v2016_v11 = vpop.eup %2015  ;;  %v746_v42 = vmul.f32 1.442695, %v728_v7  ;;  %2041 = vtanh.f32 %v1375_v17  ;;  %v2934_v45 = vadd.f32 0.5, %v1483_v63  ;;  %v1468_v2 = vmul.f32 0.5, %v2012_v28 }
 0x103   :  { %v2932_v27 = vpop.eup %2017  ;;  %2043 = vpow2.f32 %v744_v6  ;;  %v1380_v26 = vmul.f32 0.5, %v1864_v56  ;;  %v1486_v16 = vmul.f32 0.5, %v2014_v32  ;;  %v760_v57 = vmul.f32 1.442695, %v735_v60  ;;  %v792_v56 = vpop.permute.xlu0 %791 }
 0x104   :  { %3179 = vst [vmem:[#allocation42_spill] sm:$0xff] %v2934_v45  ;;  %v2020_v36 = vpop.eup %2019  ;;  %2045 = vpow2.f32 %v746_v42  ;;  %v634_v52 = vmul.f32 %v618_v40, %v618_v40  ;;  %v1466_v25 = vmul.f32 0.5, %v2016_v11  ;;  %v854_v7 = vmul.f32 %v2010_v53, %v777_v23 }
 0x105   :  { %v2022_v29 = vpop.eup %2021  ;;  %2047 = vtanh.f32 %v1397_v30  ;;  %v1395_v19 = vmul.f32 0.5, %v1314_v10  ;;  %v2936_v34 = vadd.f32 0.5, %v1463_v39  ;;  %v2938_v4 = vadd.f32 0.5, %v1488_v9  ;;  %v2945_v30 = vpop.permute.xlu1 %781 }
 0x106   :  { %v2024_v17 = vpop.eup %2023  ;;  %v730_v63 = vmul.f32 %v2865_v31, %v634_v52  ;;  %2049 = vtanh.f32 %v1380_v26  ;;  %v2941_v28 = vadd.f32 0.5, %v1468_v2  ;;  %v1378_v60 = vmul.f32 0.5, %v1247_v59  ;;  %v1250_v9 = vpop.f32.mrf.mxu0 }
 0x107   :  { %3180 = vst [vmem:[#allocation43_spill] sm:$0xff] %v2936_v34  ;;  %v2026_v6 = vpop.eup %2025  ;;  %2051 = vtanh.f32 %v1395_v19  ;;  %v588_v32 = vmul.f32 %v2794_v41, %v2745_v44  ;;  %v1534_v53 = vadd.f32 0.5, %v1486_v16  ;;  %v1489_v39 = vmul.f32 0.5, %v2022_v29 }
 0x108   :  { %3181 = vst [vmem:[#allocation44_spill] sm:$0xff] %v2941_v28  ;;  %v2028_v23 = vpop.eup %2027  ;;  %2053 = vpow2.f32 %v760_v57  ;;  %v750_v11 = vmul.f32 1.442695, %v730_v63  ;;  %v2947_v31 = vadd.f32 0.5, %v1466_v25  ;;  %v2949_v40 = vmul.f32 0.5, %v2020_v36  ;;  %v1884_v36 = vpop.f32.mrf.mxu1 }
 0x109   :  { %v2030_v42 = vpop.eup %2029  ;;  %v2952_v10 = vmul.f32 %v2730_v58, %v854_v7  ;;  %2055 = vtanh.f32 %v1378_v60  ;;  %v2954_v2 = vmul.f32 0.5, %v2024_v17  ;;  %v1472_v44 = vmul.f32 0.5, %v2026_v6  ;;  %v797_v17 = vpop.permute.xlu0 %796 }
 0x10a   :  { %3182 = vst [vmem:[#allocation45_spill] sm:$0xff] %v2947_v31  ;;  %v2032_v59 = vpop.eup %2031  ;;  %2057 = vpow2.f32 %v750_v11  ;;  %v620_v26 = vsub.f32 1.0, %v588_v32  ;;  %v1470_v29 = vmul.f32 0.5, %v2030_v42  ;;  %v1381_v57 = vmul.f32 0.5, %v1865_v43  ;;  %v2965_v11 = vpop.permute.xlu1 %703  ;;  %v3184_v31 = vld [vmem:[#allocation20_spill] sm:$0xff] }
 0x10b   :  { %3183 = vst [vmem:[#allocation46_spill] sm:$0xff] %v2954_v2  ;;  %v2956_v16 = vpop.eup %2033  ;;  %v1379_v52 = vmul.f32 0.5, %v1250_v9  ;;  %v590_v25 = vmul.f32 %v2835_v46, %v2753_v54  ;;  %v1537_v63 = vadd.f32 0.5, %v1489_v39  ;;  %v1487_v58 = vmul.f32 0.5, %v2028_v23 }
 0x10c   :  { %v2036_v19 = vpop.eup %2035  ;;  %v636_v7 = vmul.f32 %v620_v26, %v620_v26  ;;  %v857_v60 = vmul.f32 %v2917_v50, %v792_v56  ;;  %v1492_v6 = vmul.f32 0.5, %v2032_v59  ;;  %v2963_v32 = vmul.f32 %v2806_v0, %v2952_v10  ;;  %v1327_v0 = vpop.f32.mrf.mxu1 }
 0x10d   :  { %v2038_v28 = vpop.eup %2037  ;;  %2059 = vtanh.f32 %v1381_v57  ;;  %v622_v43 = vsub.f32 1.0, %v590_v25  ;;  %v1473_v54 = vmul.f32 0.5, %v2036_v19  ;;  %v1400_v23 = vmul.f32 0.5, %v1884_v36 }
 0x10e   :  { %v2967_v9 = vpop.eup %2039  ;;  %v732_v39 = vmul.f32 %v2888_v18, %v636_v7  ;;  %2061 = vtanh.f32 %v1379_v52  ;;  %v1518_v50 = vadd.f32 0.5, %v1470_v29  ;;  %v1490_v56 = vmul.f32 0.5, %v2038_v28 }
 0x10f   :  { %v2042_v42 = vpop.eup %2041  ;;  %v638_v26 = vmul.f32 %v622_v43, %v622_v43  ;;  %v2971_v59 = vmul.f32 %v2537_v37, %v857_v60  ;;  %v1520_v57 = vadd.f32 0.5, %v1472_v44  ;;  %v2974_v25 = vmul.f32 %v1534_v53, %v2952_v10  ;;  %v802_v53 = vpop.permute.xlu0 %801 }
 0x110   :  { %v2044_v45 = vpop.eup %2043  ;;  %v2978_v19 = vmul.f32 %v2952_v10, %v3184_v31  ;;  %v754_v18 = vmul.f32 1.442695, %v732_v39  ;;  %v1535_v36 = vadd.f32 0.5, %v1487_v58  ;;  %v2980_v7 = vadd.f32 0.5, %v1492_v6  ;;  %v3185_v39 = vld [vmem:[#allocation8_spill] sm:$0xff]  ;;  %v2989_v6 = vpop.permute.xlu1 %708 }
 0x111   :  { %v2046_v52 = vpop.eup %2045  ;;  %v1471_v28 = vmul.f32 0.5, %v2042_v42  ;;  %v734_v29 = vmul.f32 %v2911_v38, %v638_v26  ;;  %v1521_v60 = vadd.f32 0.5, %v1473_v54  ;;  %2063 = vtanh.f32 %v1400_v23 }
 0x112   :  { %v2048_v37 = vpop.eup %2047  ;;  %v856_v43 = vmul.f32 %v2046_v52, %v2926_v35  ;;  %v1398_v44 = vmul.f32 0.5, %v1327_v0  ;;  %v1538_v20 = vadd.f32 0.5, %v1490_v56  ;;  %v1587_v31 = vmul.f32 %v1518_v50, %v2952_v10 }
 0x113   :  { %v2050_v2 = vpop.eup %2049  ;;  %2065 = vpow2.f32 %v754_v18  ;;  %v2987_v58 = vmul.f32 %v2971_v59, %v3185_v39  ;;  %v758_v54 = vmul.f32 1.442695, %v734_v29  ;;  %v592_v35 = vmul.f32 %v2857_v33, %v2782_v62  ;;  %v3188_v33 = vld [vmem:[#allocation6_spill] sm:$0xff] }
 0x114   :  { %v2052_v42 = vpop.eup %2051  ;;  %v872_v38 = vmul.f32 %v2743_v51, %v856_v43  ;;  %v855_v23 = vmul.f32 %v2044_v45, %v2945_v30  ;;  %v1519_v56 = vadd.f32 0.5, %v1471_v28  ;;  %v2997_v50 = vmul.f32 0.5, %v2048_v37  ;;  %v3187_v37 = vld [vmem:[#allocation23_spill] sm:$0xff]  ;;  %v3013_v22 = vpop.permute.xlu1 %713 }
 0x115   :  { %v2995_v26 = vpop.eup %2053  ;;  %v1553_v0 = vmul.f32 %v2815_v5, %v2971_v59  ;;  %v859_v18 = vmul.f32 %v2932_v27, %v802_v53  ;;  %v3002_v39 = vmul.f32 0.5, %v2050_v2  ;;  %v1590_v51 = vmul.f32 %v1521_v60, %v2971_v59  ;;  %v1885_v2 = vpop.f32.mrf.mxu1  ;;  %3189 = vst [vmem:[#allocation8_spill] sm:$0xff] %v3013_v22 }
 0x116   :  { %3186 = vst [vmem:[#allocation20_spill] sm:$0xff] %v2995_v26  ;;  %v2056_v52 = vpop.eup %2055  ;;  %v1627_v29 = vmul.f32 %v1537_v63, %v2971_v59  ;;  %2067 = vtanh.f32 %v1398_v44  ;;  %v1491_v45 = vmul.f32 0.5, %v2052_v42  ;;  %v624_v43 = vsub.f32 1.0, %v592_v35 }
 0x117   :  { %v2058_v62 = vpop.eup %2057  ;;  %v1474_v30 = vmul.f32 0.5, %v2056_v52  ;;  %v871_v28 = vmul.f32 %v2735_v49, %v855_v23  ;;  %v1552_v34 = vmul.f32 %v3187_v37, %v872_v38  ;;  %2069 = vpow2.f32 %v758_v54  ;;  %v3191_v37 = vld [vmem:[#allocation22_spill] sm:$0xff]  ;;  %v1330_v12 = vpop.f32.mrf.mxu1 }
 0x118   :  { %v858_v5 = vmul.f32 %v2058_v62, %v797_v17  ;;  %v3009_v27 = vmul.f32 %v3188_v33, %v859_v18  ;;  %v1589_v53 = vmul.f32 %v1520_v57, %v872_v38  ;;  %v1626_v60 = vmul.f32 %v2938_v4, %v872_v38  ;;  %v3190_v57 = vld [vmem:[#allocation21_spill] sm:$0xff] }
 0x119   :  { %v1551_v63 = vmul.f32 %v2817_v1, %v871_v28  ;;  %v1588_v44 = vmul.f32 %v1519_v56, %v871_v28  ;;  %v1522_v35 = vadd.f32 0.5, %v1474_v30  ;;  %v640_v52 = vmul.f32 %v624_v43, %v624_v43 }
 0x11a   :  { %v2060_v42 = vpop.eup %2059  ;;  %v874_v49 = vmul.f32 %v2778_v47, %v858_v5  ;;  %v1625_v23 = vmul.f32 %v1535_v36, %v871_v28  ;;  %v1661_v18 = vadd.f32 %v871_v28, %v2952_v10  ;;  %v1683_v62 = vmul.f32 %v871_v28, %v3190_v57  ;;  %v3192_v47 = vld [vmem:[#allocation15_spill] sm:$0xff] }
 0x11b   :  { %v2062_v54 = vpop.eup %2061  ;;  %v1566_v17 = vadd.f32 %v1551_v63, %v2963_v32  ;;  %v1603_v33 = vadd.f32 %v1588_v44, %v1587_v31  ;;  %v1539_v4 = vadd.f32 0.5, %v1491_v45  ;;  %v1684_v1 = vmul.f32 %v872_v38, %v3191_v37 }
 0x11c   :  { %v1475_v56 = vmul.f32 0.5, %v2062_v54  ;;  %v736_v26 = vmul.f32 %v2930_v14, %v640_v52  ;;  %v1477_v30 = vmul.f32 0.5, %v2060_v42  ;;  %v1554_v43 = vmul.f32 %v2850_v48, %v874_v49  ;;  %v807_v52 = vpop.permute.xlu0 %806  ;;  %v3027_v42 = vpop.permute.xlu1 %718 }
 0x11d   :  { %v3193_v36 = vsub.f32 1.0, %v3192_v47  ;;  %v1401_v32 = vmul.f32 0.5, %v1885_v2  ;;  %v1567_v63 = vadd.f32 %v1566_v17, %v1552_v34  ;;  %v1604_v10 = vadd.f32 %v1603_v33, %v1589_v53  ;;  %v3194_v47 = vld [vmem:[#allocation24_spill] sm:$0xff] }
 0x11e   :  { %v1523_v31 = vadd.f32 0.5, %v1475_v56  ;;  %v1640_v28 = vadd.f32 %v1625_v23, %v2974_v25  ;;  %v2064_v45 = vpop.eup %2063  ;;  %v1591_v44 = vmul.f32 %v1522_v35, %v874_v49  ;;  %v1628_v57 = vmul.f32 %v1538_v20, %v874_v49  ;;  %v1888_v56 = vpop.f32.mrf.mxu1  ;;  %v3195_v23 = vld [vmem:[#allocation11_spill] sm:$0xff] }
 0x11f   :  { %v641_v5 = vmul.f32 %v3193_v36, %v3193_v36  ;;  %v1662_v54 = vadd.f32 %v1661_v18, %v872_v38  ;;  %v1698_v14 = vadd.f32 %v1683_v62, %v2978_v19  ;;  %v762_v37 = vmul.f32 1.442695, %v736_v26 }
 0x120   :  { %v2066_v48 = vpop.eup %2065  ;;  %v1686_v22 = vmul.f32 %v874_v49, %v3194_v47  ;;  %v1641_v36 = vadd.f32 %v1640_v28, %v1626_v60  ;;  %v1568_v2 = vadd.f32 %v1567_v63, %v1553_v0  ;;  %v1555_v25 = vmul.f32 %v2883_v61, %v3009_v27  ;;  %v3040_v28 = vpop.permute.xlu1 %723 }
 0x121   :  { %v1699_v34 = vadd.f32 %v1698_v14, %v1684_v1  ;;  %v1605_v53 = vadd.f32 %v1604_v10, %v1590_v51  ;;  %v1663_v20 = vadd.f32 %v1662_v54, %v2971_v59  ;;  %v1592_v19 = vmul.f32 %v1523_v31, %v3009_v27  ;;  %v1343_v59 = vpop.f32.mrf.mxu1  ;;  %v817_v10 = vpop.permute.xlu0 %816 }
 0x122   :  { %v1569_v38 = vadd.f32 %v1568_v2, %v1554_v43  ;;  %v1642_v35 = vadd.f32 %v1641_v36, %v1627_v29  ;;  %v1687_v17 = vmul.f32 %v3009_v27, %v3195_v23  ;;  %v737_v60 = vmul.f32 %v2965_v11, %v641_v5  ;;  %v3200_v23 = vld [vmem:[#allocation27_spill] sm:$0xff] }
 0x123   :  { %v2068_v26 = vpop.eup %2067  ;;  %v1606_v33 = vadd.f32 %v1605_v53, %v1591_v44  ;;  %v1664_v18 = vadd.f32 %v1663_v20, %v874_v49  ;;  %v1700_v0 = vadd.f32 %v1699_v34, %v2987_v58  ;;  %v1629_v61 = vmul.f32 %v1539_v4, %v3009_v27  ;;  %v3197_v20 = vld [vmem:[#allocation25_spill] sm:$0xff] }
 0x124   :  { %v1570_v62 = vadd.f32 %v1569_v38, %v1555_v25  ;;  %v1643_v51 = vadd.f32 %v1642_v35, %v1628_v57  ;;  %v860_v1 = vmul.f32 %v2066_v48, %v807_v52  ;;  %v2070_v43 = vpop.eup %2069  ;;  %2071 = vpow2.f32 %v762_v37  ;;  %v3196_v57 = vld [vmem:[#allocation26_spill] sm:$0xff]  ;;  %v1889_v52 = vpop.f32.mrf.mxu1 }
 0x125   :  { %v1607_v31 = vadd.f32 %v1606_v33, %v1592_v19  ;;  %v1665_v29 = vadd.f32 %v1664_v18, %v3009_v27  ;;  %v1701_v63 = vadd.f32 %v1700_v0, %v1686_v22  ;;  %v1494_v49 = vmul.f32 0.5, %v2068_v26  ;;  %v812_v53 = vpop.permute.xlu1 %811  ;;  %v3199_v35 = vld [vmem:[#allocation18_spill] sm:$0xff] }
 0x126   :  { %v1644_v44 = vadd.f32 %v1643_v51, %v1629_v61  ;;  %v764_v58 = vmul.f32 1.442695, %v737_v60  ;;  %v1399_v54 = vmul.f32 0.5, %v1330_v12  ;;  %v1524_v11 = vadd.f32 0.5, %v3002_v39 }
 0x127   :  { %v1702_v5 = vadd.f32 %v1701_v63, %v1687_v17  ;;  %v876_v4 = vmul.f32 %v2794_v41, %v860_v1  ;;  %v594_v14 = vmul.f32 %v2874_v13, %v3196_v57  ;;  %v3048_v27 = vmul.f32 %v2956_v16, %v2885_v3 }
 0x128   :  { %v3051_v22 = vadd.f32 0.5, %v2949_v40  ;;  %2073 = vtanh.f32 %v1401_v32  ;;  %v862_v48 = vmul.f32 %v2070_v43, %v817_v10  ;;  %v1541_v12 = vadd.f32 0.5, %v2997_v50  ;;  %v1346_v40 = vpop.f32.mrf.mxu1 }
 0x129   :  { %v1525_v37 = vadd.f32 0.5, %v1477_v30  ;;  %2075 = vtanh.f32 %v1399_v54  ;;  %v626_v39 = vsub.f32 1.0, %v594_v14  ;;  %v3054_v47 = vmul.f32 0.5, %v2064_v45  ;;  %v822_v43 = vpop.permute.xlu1 %821 }
 0x12a   :  { %v1542_v41 = vadd.f32 0.5, %v1494_v49  ;;  %2077 = vpow2.f32 %v764_v58  ;;  %v1404_v36 = vmul.f32 0.5, %v1888_v56  ;;  %v1556_v2 = vmul.f32 %v2831_v21, %v876_v4  ;;  %v3198_v56 = vld [vmem:[#allocation9_spill] sm:$0xff]  ;;  %v3202_v58 = vld [vmem:[#allocation8_spill] sm:$0xff] }
 0x12b   :  { %v1593_v34 = vmul.f32 %v1524_v11, %v876_v4  ;;  %v1630_v3 = vmul.f32 %v2980_v7, %v876_v4  ;;  %v642_v25 = vmul.f32 %v626_v39, %v626_v39  ;;  %v1666_v32 = vadd.f32 %v1665_v29, %v876_v4  ;;  %v3201_v7 = vld [vmem:[#allocation12_spill] sm:$0xff]  ;;  %v827_v11 = vpop.permute.xlu0 %826  ;;  %v3206_v39 = vld [vmem:[#allocation31_spill] sm:$0xff] }
 0x12c   :  { %v1688_v38 = vmul.f32 %v876_v4, %v3197_v20  ;;  %v3060_v50 = vmul.f32 %v2835_v46, %v862_v48  ;;  %v1402_v30 = vmul.f32 0.5, %v1343_v59  ;;  %v1571_v45 = vadd.f32 %v1570_v62, %v1556_v2 }
 0x12d   :  { %v738_v19 = vmul.f32 %v2989_v6, %v642_v25  ;;  %2079 = vtanh.f32 %v1404_v36  ;;  %v595_v21 = vmul.f32 %v3199_v35, %v3198_v56  ;;  %v532_v17 = vadd.f32 %v3201_v7, %v3200_v23  ;;  %v832_v7 = vpop.permute.xlu1 %831 }
 0x12e   :  { %2081 = vtanh.f32 %v1402_v30  ;;  %v1403_v26 = vmul.f32 0.5, %v1346_v40  ;;  %v597_v33 = vmul.f32 %v2956_v16, %v2900_v15  ;;  %v1608_v18 = vadd.f32 %v1607_v31, %v1593_v34 }
 0x12f   :  { %v766_v0 = vmul.f32 1.442695, %v738_v19  ;;  %v627_v46 = vsub.f32 1.0, %v595_v21  ;;  %v1405_v60 = vmul.f32 0.5, %v1889_v52  ;;  %v596_v62 = vmul.f32 %v2898_v24, %v532_v17  ;;  %v3207_v21 = vld [vmem:[#allocation14_spill] sm:$0xff] }
 0x130   :  { %2083 = vtanh.f32 %v1403_v26  ;;  %v629_v6 = vsub.f32 1.0, %v597_v33  ;;  %v861_v61 = vmul.f32 %v2967_v9, %v812_v53  ;;  %v1645_v51 = vadd.f32 %v1644_v44, %v1630_v3  ;;  %v3203_v9 = vld [vmem:[#allocation7_spill] sm:$0xff] }
 0x131   :  { %v1703_v1 = vadd.f32 %v1702_v5, %v1688_v38  ;;  %2085 = vpow2.f32 %v766_v0  ;;  %v643_v59 = vmul.f32 %v627_v46, %v627_v46  ;;  %v2072_v29 = vpop.eup %2071  ;;  %v1558_v63 = vmul.f32 %v2915_v8, %v3060_v50  ;;  %v3204_v5 = vld [vmem:[#allocation29_spill] sm:$0xff]  ;;  %v3205_v8 = vld [vmem:[#allocation20_spill] sm:$0xff] }
 0x132   :  { %v1595_v15 = vmul.f32 %v2842_v55, %v3060_v50  ;;  %v628_v31 = vsub.f32 1.0, %v596_v62  ;;  %v645_v10 = vmul.f32 %v629_v6, %v629_v6  ;;  %v1632_v49 = vmul.f32 %v1542_v41, %v3060_v50  ;;  %v3211_v6 = vld [vmem:[#allocation33_spill] sm:$0xff] }
 0x133   :  { %v739_v54 = vmul.f32 %v3202_v58, %v643_v59  ;;  %2087 = vtanh.f32 %v1405_v60  ;;  %v877_v44 = vmul.f32 %v3203_v9, %v861_v61  ;;  %v1690_v4 = vmul.f32 %v3060_v50, %v3204_v5  ;;  %v3213_v9 = vld [vmem:[#allocation46_spill] sm:$0xff] }
 0x134   :  { %v644_v57 = vmul.f32 %v628_v31, %v628_v31  ;;  %v741_v14 = vmul.f32 %v3040_v28, %v645_v10  ;;  %v863_v52 = vmul.f32 %v3205_v8, %v822_v43  ;;  %v864_v3 = vmul.f32 %v2072_v29, %v827_v11  ;;  %v3212_v31 = vld [vmem:[#allocation16_spill] sm:$0xff] }
 0x135   :  { %v2074_v48 = vpop.eup %2073  ;;  %v768_v55 = vmul.f32 1.442695, %v739_v54  ;;  %v1557_v36 = vmul.f32 %v3206_v39, %v877_v44  ;;  %v1594_v2 = vmul.f32 %v1525_v37, %v877_v44  ;;  %v1631_v41 = vmul.f32 %v1541_v12, %v877_v44  ;;  %v3208_v37 = vld [vmem:[#allocation10_spill] sm:$0xff] }
 0x136   :  { %v2076_v34 = vpop.eup %2075  ;;  %v740_v25 = vmul.f32 %v3027_v42, %v644_v57  ;;  %v772_v40 = vmul.f32 1.442695, %v741_v14  ;;  %v1667_v53 = vadd.f32 %v1666_v32, %v877_v44  ;;  %v1689_v23 = vmul.f32 %v877_v44, %v3207_v21  ;;  %v3209_v42 = vld [vmem:[#allocation32_spill] sm:$0xff]  ;;  %v837_v57 = vpop.permute.xlu0 %836 }
 0x137   :  { %v2078_v20 = vpop.eup %2077  ;;  %v1495_v38 = vmul.f32 0.5, %v2076_v34  ;;  %2089 = vpow2.f32 %v768_v55  ;;  %v1572_v30 = vadd.f32 %v1571_v45, %v1557_v36  ;;  %v1609_v19 = vadd.f32 %v1608_v18, %v1594_v2  ;;  %v3210_v45 = vld [vmem:[#allocation43_spill] sm:$0xff]  ;;  %v3216_v34 = vld [vmem:[#allocation34_spill] sm:$0xff] }
 0x138   :  { %v770_v28 = vmul.f32 1.442695, %v740_v25  ;;  %2091 = vpow2.f32 %v772_v40  ;;  %v1646_v56 = vadd.f32 %v1645_v51, %v1631_v41  ;;  %v879_v12 = vmul.f32 %v3208_v37, %v863_v52  ;;  %v842_v52 = vpop.permute.xlu1 %841  ;;  %v3218_v37 = vld [vmem:[#allocation45_spill] sm:$0xff] }
 0x139   :  { %v1543_v17 = vadd.f32 0.5, %v1495_v38  ;;  %v1573_v26 = vadd.f32 %v1572_v30, %v1558_v63  ;;  %v1610_v33 = vadd.f32 %v1609_v19, %v1595_v15  ;;  %v880_v46 = vmul.f32 %v3209_v42, %v864_v3  ;;  %v3217_v30 = vld [vmem:[#allocation13_spill] sm:$0xff]  ;;  %v3220_v42 = vld [vmem:[#allocation30_spill] sm:$0xff] }
 0x13a   :  { %v2080_v0 = vpop.eup %2079  ;;  %2093 = vpow2.f32 %v770_v28  ;;  %v1704_v32 = vadd.f32 %v1703_v1, %v1689_v23  ;;  %v1647_v60 = vadd.f32 %v1646_v56, %v1632_v49  ;;  %v1559_v18 = vmul.f32 %v3210_v45, %v879_v12  ;;  %v3221_v45 = vld [vmem:[#allocation39_spill] sm:$0xff] }
 0x13b   :  { %v2082_v62 = vpop.eup %2081  ;;  %v1596_v61 = vmul.f32 %v3211_v6, %v879_v12  ;;  %v1633_v51 = vmul.f32 %v1543_v17, %v879_v12  ;;  %v1668_v59 = vadd.f32 %v1667_v53, %v3060_v50  ;;  %v1544_v43 = vadd.f32 0.5, %v3054_v47  ;;  %v3214_v50 = vld [vmem:[#allocation37_spill] sm:$0xff] }
 0x13c   :  { %v1497_v29 = vmul.f32 0.5, %v2074_v48  ;;  %v1691_v63 = vmul.f32 %v879_v12, %v3212_v31  ;;  %v1705_v15 = vadd.f32 %v1704_v32, %v1690_v4  ;;  %v1498_v58 = vmul.f32 0.5, %v2082_v62  ;;  %v3215_v4 = vld [vmem:[#allocation28_spill] sm:$0xff]  ;;  %v852_v62 = vpop.permute.xlu1 %851 }
 0x13d   :  { %v2084_v10 = vpop.eup %2083  ;;  %v1574_v54 = vadd.f32 %v1573_v26, %v1559_v18  ;;  %v1611_v11 = vadd.f32 %v1610_v33, %v1596_v61  ;;  %v1648_v1 = vadd.f32 %v1647_v60, %v1633_v51  ;;  %v1515_v44 = vadd.f32 0.5, %v3213_v9  ;;  %v3219_v33 = vld [vmem:[#allocation41_spill] sm:$0xff] }
 0x13e   :  { %v2086_v49 = vpop.eup %2085  ;;  %v1500_v5 = vmul.f32 0.5, %v2080_v0  ;;  %v1669_v14 = vadd.f32 %v1668_v59, %v879_v12  ;;  %v1706_v8 = vadd.f32 %v1705_v15, %v1691_v63  ;;  %v1560_v55 = vmul.f32 %v3214_v50, %v880_v46  ;;  %v3222_v61 = vld [vmem:[#allocation17_spill] sm:$0xff]  ;;  %v3224_v50 = vld [vmem:[#allocation42_spill] sm:$0xff] }
 0x13f   :  { %v866_v47 = vmul.f32 %v2086_v49, %v837_v57  ;;  %v1499_v48 = vmul.f32 0.5, %v2084_v10  ;;  %v865_v39 = vmul.f32 %v2078_v20, %v832_v7  ;;  %v1597_v2 = vmul.f32 %v3215_v4, %v880_v46  ;;  %v3223_v10 = vld [vmem:[#allocation36_spill] sm:$0xff] }
 0x140   :  { %v2088_v36 = vpop.eup %2087  ;;  %v1634_v41 = vmul.f32 %v1544_v43, %v880_v46  ;;  %v1692_v3 = vmul.f32 %v880_v46, %v3216_v34  ;;  %v1670_v25 = vadd.f32 %v1669_v14, %v880_v46  ;;  %v1545_v40 = vadd.f32 0.5, %v1497_v29 }
 0x141   :  { %v1546_v53 = vadd.f32 0.5, %v1498_v58  ;;  %v882_v38 = vmul.f32 %v2874_v13, %v866_v47  ;;  %v881_v19 = vmul.f32 %v3217_v30, %v865_v39  ;;  %v1548_v28 = vadd.f32 0.5, %v1500_v5  ;;  %v3225_v39 = vld [vmem:[#allocation19_spill] sm:$0xff]  ;;  %v3228_v30 = vld [vmem:[#allocation38_spill] sm:$0xff] }
 0x142   :  { %v1575_v56 = vadd.f32 %v1574_v54, %v1560_v55  ;;  %v1612_v21 = vadd.f32 %v1611_v11, %v1597_v2  ;;  %v1649_v23 = vadd.f32 %v1648_v1, %v1634_v41  ;;  %v1501_v17 = vmul.f32 0.5, %v2088_v36  ;;  %v847_v54 = vpop.permute.xlu0 %846 }
 0x143   :  { %v1562_v20 = vmul.f32 %v3218_v37, %v882_v38  ;;  %v1547_v7 = vadd.f32 0.5, %v1499_v48  ;;  %v1707_v12 = vadd.f32 %v1706_v8, %v1692_v3  ;;  %v1561_v0 = vmul.f32 %v3219_v33, %v881_v19 }
 0x144   :  { %v2090_v26 = vpop.eup %2089  ;;  %v1598_v46 = vmul.f32 %v3220_v42, %v881_v19  ;;  %v1635_v32 = vmul.f32 %v1545_v40, %v881_v19  ;;  %v1671_v60 = vadd.f32 %v1670_v25, %v881_v19  ;;  %v1599_v18 = vmul.f32 %v3221_v45, %v882_v38  ;;  %v3226_v25 = vld [vmem:[#allocation44_spill] sm:$0xff] }
 0x145   :  { %v2092_v13 = vpop.eup %2091  ;;  %v1636_v6 = vmul.f32 %v1546_v53, %v882_v38  ;;  %v1693_v51 = vmul.f32 %v881_v19, %v3222_v61  ;;  %v867_v59 = vmul.f32 %v2090_v26, %v842_v52  ;;  %v1576_v43 = vadd.f32 %v1575_v56, %v1561_v0  ;;  %v3227_v53 = vld [vmem:[#allocation35_spill] sm:$0xff] }
 0x146   :  { %v1613_v29 = vadd.f32 %v1612_v21, %v1598_v46  ;;  %v1650_v31 = vadd.f32 %v1649_v23, %v1635_v32  ;;  %v1672_v63 = vadd.f32 %v1671_v60, %v882_v38  ;;  %v1694_v58 = vmul.f32 %v882_v38, %v3223_v10 }
 0x147   :  { %v2094_v15 = vpop.eup %2093  ;;  %v1708_v11 = vadd.f32 %v1707_v12, %v1693_v51  ;;  %v883_v1 = vmul.f32 %v3199_v35, %v867_v59  ;;  %v869_v49 = vmul.f32 %v2092_v13, %v852_v62  ;;  %v1577_v5 = vadd.f32 %v1576_v43, %v1562_v20 }
 0x148   :  { %v868_v9 = vmul.f32 %v2094_v15, %v847_v54  ;;  %v1614_v57 = vadd.f32 %v1613_v29, %v1599_v18  ;;  %v1651_v14 = vadd.f32 %v1650_v31, %v1636_v6  ;;  %v1549_v41 = vadd.f32 0.5, %v1501_v17 }
 0x149   :  { %v1563_v8 = vmul.f32 %v1515_v44, %v883_v1  ;;  %v1600_v55 = vmul.f32 %v3224_v50, %v883_v1  ;;  %v1637_v52 = vmul.f32 %v1547_v7, %v883_v1  ;;  %v1673_v47 = vadd.f32 %v1672_v63, %v883_v1 }
 0x14a   :  { %v884_v48 = vmul.f32 %v2898_v24, %v868_v9  ;;  %v1695_v36 = vmul.f32 %v883_v1, %v3225_v39  ;;  %v1709_v4 = vadd.f32 %v1708_v11, %v1694_v58  ;;  %v885_v2 = vmul.f32 %v2956_v16, %v869_v49  ;;  %v3229_v24 = vld [vmem:[#allocation40_spill] sm:$0xff] }
 0x14b   :  { %v1578_v34 = vadd.f32 %v1577_v5, %v1563_v8  ;;  %v1615_v35 = vadd.f32 %v1614_v57, %v1600_v55  ;;  %v1652_v3 = vadd.f32 %v1651_v14, %v1637_v52 }
 0x14c   :  { %v1564_v40 = vmul.f32 %v3226_v25, %v884_v48  ;;  %v1601_v38 = vmul.f32 %v3227_v53, %v884_v48  ;;  %v1638_v44 = vmul.f32 %v1548_v28, %v884_v48  ;;  %v1696_v19 = vmul.f32 %v884_v48, %v3228_v30 }
 0x14d   :  { %v1710_v56 = vadd.f32 %v1709_v4, %v1695_v36  ;;  %v1565_v21 = vmul.f32 %v3051_v22, %v885_v2  ;;  %v1602_v23 = vmul.f32 %v3229_v24, %v885_v2  ;;  %v1639_v37 = vmul.f32 %v1549_v41, %v885_v2  ;;  %v3230_v41 = vld [vmem:[#allocation5_spill] sm:$0xff] }
 0x14e   :  { %v1579_v20 = vadd.f32 %v1578_v34, %v1564_v40  ;;  %v1616_v7 = vadd.f32 %v1615_v35, %v1601_v38  ;;  %v1653_v16 = vadd.f32 %v1652_v3, %v1638_v44  ;;  %v1674_v17 = vadd.f32 %v1673_v47, %v884_v48 }
 0x14f   :  { %v1697_v12 = vmul.f32 %v885_v2, %v3048_v27  ;;  %v1711_v26 = vadd.f32 %v1710_v56, %v1696_v19  ;;  %v3231_v34 = vsub.s32 3, %v3230_v41 }
 0x150   :  { %v1580_v33 = vadd.f32 %v1579_v20, %v1565_v21  ;;  %v1617_v0 = vadd.f32 %v1616_v7, %v1602_v23  ;;  %v1654_v42 = vadd.f32 %v1653_v16, %v1639_v37  ;;  %v1675_v46 = vadd.f32 %v1674_v17, %v885_v2 }
 0x151   :  { %v1712_v28 = vadd.f32 %v1711_v26, %v1697_v12 }
 0x152   :  { %v1581_v32 = vrot.slane %v1580_v33, 4  ;;  %v1618_v60 = vrot.slane %v1617_v0, 4  ;;  %v1655_v62 = vrot.slane %v1654_v42, 4  ;;  %v1676_v13 = vrot.slane %v1675_v46, 4 }
 0x153   :  { %v1713_v22 = vrot.slane %v1712_v28, 4 }
 0x154   :  { %v1582_v45 = vadd.f32 %v1581_v32, %v1580_v33  ;;  %v1619_v18 = vadd.f32 %v1618_v60, %v1617_v0  ;;  %v1656_v6 = vadd.f32 %v1655_v62, %v1654_v42  ;;  %v1677_v61 = vadd.f32 %v1676_v13, %v1675_v46 }
 0x155   :  { %v1714_v51 = vadd.f32 %v1713_v22, %v1712_v28 }
 0x156   :  { %v1583_v59 = vrot.slane %v1582_v45, 2  ;;  %v1620_v43 = vrot.slane %v1619_v18, 2  ;;  %v1657_v29 = vrot.slane %v1656_v6, 2  ;;  %v1678_v27 = vrot.slane %v1677_v61, 2 }
 0x157   :  { %v1715_v31 = vrot.slane %v1714_v51, 2 }
 0x158   :  { %v1584_v63 = vadd.f32 %v1583_v59, %v1582_v45  ;;  %v1621_v15 = vadd.f32 %v1620_v43, %v1619_v18  ;;  %v1658_v10 = vadd.f32 %v1657_v29, %v1656_v6  ;;  %v1679_v58 = vadd.f32 %v1678_v27, %v1677_v61 }
 0x159   :  { %v1716_v54 = vadd.f32 %v1715_v31, %v1714_v51 }
 0x15a   :  { %v1585_v11 = vrot.slane %v1584_v63, 1  ;;  %v1622_v1 = vrot.slane %v1621_v15, 1  ;;  %v1659_v49 = vrot.slane %v1658_v10, 1  ;;  %v1680_v9 = vrot.slane %v1679_v58, 1 }
 0x15b   :  { %v1717_v5 = vrot.slane %v1716_v54, 1 }
 0x15c   :  { %v1586_v57 = vadd.f32 %v1585_v11, %v1584_v63  ;;  %v1623_v14 = vadd.f32 %v1622_v1, %v1621_v15  ;;  %v1660_v8 = vadd.f32 %v1659_v49, %v1658_v10  ;;  %v1681_v50 = vadd.f32 %v1680_v9, %v1679_v58 }
 0x15d   :  { %v1718_v52 = vadd.f32 %v1717_v5, %v1716_v54 }
 0x15e   :  { %v1721_v55 = vsel %vm1720_vm1, %v1586_v57, %v1623_v14 }
 0x15f   :  { %v1723_v47 = vsel %vm1722_vm2, %v1721_v55, %v1660_v8 }
 0x160   :  { %v1725_v48 = vsel %vm1724_vm3, %v1723_v47, %v1681_v50 }
 0x161   :  { %v1727_v39 = vsel %vm1726_vm4, %v1725_v48, %v1718_v52 }
 0x162   :  { %v1729_v36 = vsel %vm1728_vm5, %v1727_v39, 0.0 }
 0x163   :  { %v1736_v4 = vadd.f32 1e-08, %v1729_v36 }
 0x165   :  { %2095 = vrcp.f32 %v1736_v4 }
 0x172   :  { %v2096_v2 = vpop.eup %2095 }
 0x173   :  { %v1742_v35 = vrot.slane %v2096_v2, %v3231_v34  ;;  %v1745_v3 = vrot.slane %v2096_v2, 7 }
 0x175   :  { %v1743_v25 = vmul.f32 %v1742_v35, %v1729_v36  ;;  %v1747_v40 = vmul.f32 %v1745_v3, %v1729_v36 }
 0x177   :  { %v1748_v53 = vsel %vm1724_vm3, %v1743_v25, %v1729_v36 }
 0x178   :  { %v1749_v38 = vsel %vm1726_vm4, %v1748_v53, %v1747_v40 }
 0x179   :  { %v1750_v44 = vsel %vm1728_vm5, %v1749_v38, %v1729_v36 }
 0x17a   :  { %1751 = vst [vmem:[#allocation2] sm:$0xff] %v1750_v44 }
 0x17b   :  { %2108 = shalt.err (!%p2105_p4)
}
 0x17c   :  { %1761 = dma.vmem_to_hbm [thread:$0]  %s1759_s25, 128, %s3131_s5, [#allocation3]  }
 0x17d   :  { %2117 = dma.done.wait [#allocation3], 128  }
 0x17e   :  { %2118 = vsyncadd [#allocation3], 4294967168 }
 0x17f   :  { %1765 = vsyncpa [#allocation3], 1 }

</bundles_post_ra>
